<compile_context>
chip_gen: v5e
topology: v5e:2x2
jax: 0.10.0
libtpu: 0.0.40
codegen_flags: <defaults>
</compile_context>

<pallas_src>
import numpy as np
import jax
import jax.numpy as jnp
from jax.experimental import pallas as pl
from jax.experimental.pallas import tpu as pltpu


def _uig_body(x, m, pop_ref, nic_ref):
    """Shared tile body: in-kernel Haar pair split + masked, gated softmax (two branches).

    x: (tu, Ip) f32 densified user-item values (zeros off the nnz pattern)
    m: (tu, Ip) f32 nnz mask in {0, 1}
    """
    tu, Ip = x.shape

    # Haar level-1: popular = pair average (same value on both pair members),
    # niche = residual. Pair partner of column j is j+1 (j even) / j-1 (j odd).
    # Lane rotations run on the otherwise-idle XLU slot; parity mask is a (1, Ip)
    # row that broadcasts over sublanes (no tile-sized int32 temporary).
    col = jax.lax.broadcasted_iota(jnp.int32, (1, Ip), 1)
    is_even = (col & 1) == 0
    nxt = pltpu.roll(x, Ip - 1, axis=1)   # x[:, j+1] at column j (== np.roll(x, -1))
    prv = pltpu.roll(x, 1, axis=1)        # x[:, j-1] at column j
    avg = (x + jnp.where(is_even, nxt, prv)) * 0.5
    niche = x - avg

    mask_pos = m > 0.0
    neg = jnp.float32(-1e30)

    def gated_masked_softmax(v):
        vm = v * m
        raw_sum = jnp.sum(vm, axis=-1, keepdims=True)            # == torch.sum(gathered)
        v_masked = jnp.where(mask_pos, v, neg)
        mx = jnp.max(v_masked, axis=-1, keepdims=True)
        # Reuse v_masked as the exp argument: off-pattern lanes underflow to 0,
        # fully-masked rows give exp(0) * m(=0) = 0 -> no NaN/Inf anywhere.
        e = jnp.exp(v_masked - mx) * m
        denom = jnp.maximum(jnp.sum(e, axis=-1, keepdims=True), jnp.float32(1e-30))
        inv = pl.reciprocal(denom, approx=True)                   # EUP slot
        inv = inv * (2.0 - denom * inv)                           # one Newton step -> ~f32 exact
        return jnp.where(raw_sum > 0.0, e * inv, vm)              # gate matches the reference

    pop_ref[...] = gated_masked_softmax(avg).astype(pop_ref.dtype)
    nic_ref[...] = gated_masked_softmax(niche).astype(nic_ref.dtype)


def _uig_kernel_derive(x_ref, pop_ref, nic_ref):
    """Mask derived in-kernel (x != 0): one fewer HBM input stream."""
    x = x_ref[...]
    m = (x != 0.0).astype(jnp.float32)
    _uig_body(x, m, pop_ref, nic_ref)


def _uig_kernel_masked(x_ref, m_ref, pop_ref, nic_ref):
    """Explicit int8 nnz mask (handles explicit-zero nnz entries)."""
    x = x_ref[...]
    m = m_ref[...].astype(jnp.float32)
    _uig_body(x, m, pop_ref, nic_ref)


def _pick_tile_rows(U, Ip, bytes_per_elem):
    """Right-sized user tile: ~8-16 MiB double-buffered working set, >= 4 grid steps."""
    target = 12 << 20                      # per-step double-buffered working-set target
    per_row_db = 2 * Ip * bytes_per_elem   # double-buffered bytes per user row
    u_cap = ((U + 31) // 32) * 32
    tu = min(max(target // per_row_db, 32), 512, u_cap)
    # Keep >= 4 grid steps when U allows it: 2 steps per TensorCore on v7x megacore
    # so the DMA pipeline overlaps compute on every core.
    min_steps = 4
    if U >= min_steps * 32:
        tu = min(tu, -(-U // min_steps))
    tu = max(32, (tu // 32) * 32)          # sublane packing (also int8 mask friendly)
    return int(tu)


def uig_forward(R_dense, mask=None, *, tu=None, out_dtype=jnp.float32):
    """Returns (UIPG, UING) densified: values on R's nnz pattern, zeros elsewhere.

    If `mask is None`, the nnz pattern is derived in-kernel as R_dense != 0 (valid when
    every stored nnz value is nonzero, as for this dataset); otherwise an explicit
    boolean/0-1 mask is streamed as int8.
    """
    U, I = R_dense.shape
    assert I % 2 == 0, "haar level-1 pairing needs an even item count"

    # Pad items to a lane-dense multiple of 128 (even -> whole zero pairs, no effect on
    # real items); pad users to a multiple of the tile (zero rows emit zeros).
    Ip = ((I + 127) // 128) * 128
    derive_mask = mask is None
    out_isz = np.dtype(out_dtype).itemsize
    bytes_per_elem = 4 + 2 * out_isz + (0 if derive_mask else 1)
    if tu is None:
        tu = _pick_tile_rows(U, Ip, bytes_per_elem)
    Up = ((U + tu - 1) // tu) * tu

    x = R_dense.astype(jnp.float32)
    if (Up, Ip) != (U, I):
        x = jnp.pad(x, ((0, Up - U), (0, Ip - I)))

    spec = pl.BlockSpec((tu, Ip), lambda i: (i, 0))
    out_sd = jax.ShapeDtypeStruct((Up, Ip), out_dtype)

    # Right-sized VMEM request: per-step working set (double-buffered) + headroom,
    # capped well under physical capacity so Mosaic scratch fits even on v7x (64 MiB/TC).
    needed = 2 * tu * Ip * bytes_per_elem
    vmem_limit = int(min(48 << 20, max(32 << 20, needed + (8 << 20))))

    if derive_mask:
        kernel = _uig_kernel_derive
        in_specs = [spec]
        operands = (x,)
    else:
        m8 = (mask != 0).astype(jnp.int8)
        if (Up, Ip) != (U, I):
            m8 = jnp.pad(m8, ((0, Up - U), (0, Ip - I)))
        kernel = _uig_kernel_masked
        in_specs = [spec, spec]
        operands = (x, m8)

    uipg, uing = pl.pallas_call(
        kernel,
        out_shape=(out_sd, out_sd),
        grid_spec=pltpu.PrefetchScalarGridSpec(
            num_scalar_prefetch=0,
            grid=(Up // tu,),
            in_specs=in_specs,
            out_specs=[spec, spec],
        ),
        compiler_params=pltpu.CompilerParams(
            dimension_semantics=("parallel",),
            vmem_limit_bytes=vmem_limit,
        ),
    )(*operands)

    if (Up, Ip) != (U, I):
        uipg = uipg[:U, :I]
        uing = uing[:U, :I]
    return uipg, uing


def _softmax_np(v):
    e = np.exp(v - v.max())
    return e / e.sum()


def _uig_reference(R, mask):
    """Pure-numpy replica of UIG.forward (haar, level=1), densified outputs."""
    U, I = R.shape
    pop = np.zeros_like(R)
    nic = np.zeros_like(R)
    for u in range(U):
        x = R[u]
        avg = (x[0::2] + x[1::2]) / 2.0
        p = np.repeat(avg, 2)
        n = x - p
        idx = np.nonzero(mask[u])[0]
        if idx.size == 0:
            continue
        pv, nv = p[idx], n[idx]
        if pv.sum() > 0:
            pv = _softmax_np(pv)
        if nv.sum() > 0:
            nv = _softmax_np(nv)
        pop[u, idx] = pv
        nic[u, idx] = nv
    return pop, nic


if __name__ == "__main__":
    key = jax.random.PRNGKey(0)

    # Small synthetic user-item graphs (real problem: 19445 x 7050).
    for (U, I) in [(256, 256), (70, 218)]:
        k_mask, k_val, key = jax.random.split(key, 3)
        mask = jax.random.bernoulli(k_mask, p=0.1, shape=(U, I))
        vals = jax.random.uniform(k_val, (U, I), dtype=jnp.float32,
                                  minval=0.01, maxval=1.0)
        R_dense = vals * mask.astype(jnp.float32)  # densified sparse user-item graph

        ref_pop, ref_nic = _uig_reference(np.asarray(R_dense),
                                          np.asarray(mask, dtype=np.float32))

        # Path 1: mask derived in-kernel from x != 0 (one fewer HBM input stream).
        uipg, uing = uig_forward(R_dense)
        uipg = jax.block_until_ready(uipg)
        uing = jax.block_until_ready(uing)
        np.testing.assert_allclose(np.asarray(uipg), ref_pop, rtol=1e-4, atol=1e-6)
        np.testing.assert_allclose(np.asarray(uing), ref_nic, rtol=1e-4, atol=1e-6)

        # Path 2: explicit int8 nnz mask (general case with explicit-zero nnz entries).
        uipg2, uing2 = uig_forward(R_dense, mask)
        uipg2 = jax.block_until_ready(uipg2)
        uing2 = jax.block_until_ready(uing2)
        np.testing.assert_allclose(np.asarray(uipg2), ref_pop, rtol=1e-4, atol=1e-6)
        np.testing.assert_allclose(np.asarray(uing2), ref_nic, rtol=1e-4, atol=1e-6)

    print("KERNEL_OK")
</pallas_src>

<mosaic_0001>
module attributes {stable_mosaic.version = 11 : i64} {
  func.func @_uig_kernel_derive(%arg0: i32, %arg1: memref<64x256xf32, #tpu.memory_space<vmem>>, %arg2: memref<64x256xf32, #tpu.memory_space<vmem>>, %arg3: memref<64x256xf32, #tpu.memory_space<vmem>>) attributes {dimension_semantics = [#tpu.dimension_semantics<parallel>], iteration_bounds = array<i64: 4>, scalar_prefetch = 0 : i64, scratch_operands = 0 : i64, tpu.core_type = #tpu.core_type<tc>, window_params = [{transform_indices = @transform_0, window_bounds = array<i64: 64, 256>}, {transform_indices = @transform_1, window_bounds = array<i64: 64, 256>}, {transform_indices = @transform_2, window_bounds = array<i64: 64, 256>}]} {
    %c0 = arith.constant 0 : index
    %c0_0 = arith.constant 0 : index
    %0 = vector.load %arg1[%c0, %c0_0] : memref<64x256xf32, #tpu.memory_space<vmem>>, vector<64x256xf32>
    %cst = arith.constant 0.000000e+00 : f32
    %1 = vector.broadcast %cst : f32 to vector<64x256xf32>
    %2 = arith.cmpf one, %0, %1 : vector<64x256xf32>
    %3 = arith.extui %2 : vector<64x256xi1> to vector<64x256xi32>
    %4 = arith.sitofp %3 : vector<64x256xi32> to vector<64x256xf32>
    %5 = tpu.iota {dimensions = array<i32: 1>} : vector<1x256xi32>
    %c1_i32 = arith.constant 1 : i32
    %6 = vector.broadcast %c1_i32 : i32 to vector<1x256xi32>
    %7 = arith.andi %5, %6 : vector<1x256xi32>
    %c0_i32 = arith.constant 0 : i32
    %8 = vector.broadcast %c0_i32 : i32 to vector<1x256xi32>
    %9 = arith.cmpi eq, %7, %8 : vector<1x256xi32>
    %c255_i32 = arith.constant 255 : i32
    %10 = tpu.dynamic_rotate %0 by %c255_i32 dim 1 : vector<64x256xf32>, i32 -> vector<64x256xf32>
    %c1_i32_1 = arith.constant 1 : i32
    %11 = tpu.dynamic_rotate %0 by %c1_i32_1 dim 1 : vector<64x256xf32>, i32 -> vector<64x256xf32>
    %12 = vector.shape_cast %9 : vector<1x256xi1> to vector<1x256xi1>
    %13 = vector.broadcast %12 : vector<1x256xi1> to vector<64x256xi1>
    %14 = arith.select %13, %10, %11 : vector<64x256xi1>, vector<64x256xf32>
    %15 = arith.addf %0, %14 : vector<64x256xf32>
    %cst_2 = arith.constant 5.000000e-01 : f32
    %16 = vector.broadcast %cst_2 : f32 to vector<64x256xf32>
    %17 = arith.mulf %15, %16 : vector<64x256xf32>
    %18 = arith.subf %0, %17 : vector<64x256xf32>
    %cst_3 = arith.constant 0.000000e+00 : f32
    %19 = vector.broadcast %cst_3 : f32 to vector<64x256xf32>
    %20 = arith.cmpf ogt, %4, %19 : vector<64x256xf32>
    %21 = arith.mulf %17, %4 : vector<64x256xf32>
    %cst_4 = arith.constant dense<0.000000e+00> : vector<64xf32>
    %22 = vector.multi_reduction <add>, %21, %cst_4 [1] : vector<64x256xf32> to vector<64xf32>
    %23 = vector.shape_cast %22 : vector<64xf32> to vector<64x1xf32>
    %cst_5 = arith.constant -1.000000e+30 : f32
    %24 = vector.broadcast %cst_5 : f32 to vector<64x256xf32>
    %25 = arith.select %20, %17, %24 : vector<64x256xi1>, vector<64x256xf32>
    %cst_6 = arith.constant dense<0xFF800000> : vector<64xf32>
    %26 = vector.multi_reduction <maximumf>, %25, %cst_6 [1] : vector<64x256xf32> to vector<64xf32>
    %27 = vector.shape_cast %26 : vector<64xf32> to vector<64x1xf32>
    %28 = vector.broadcast %27 : vector<64x1xf32> to vector<64x256xf32>
    %29 = arith.subf %25, %28 : vector<64x256xf32>
    %30 = math.exp %29 : vector<64x256xf32>
    %31 = arith.mulf %30, %4 : vector<64x256xf32>
    %cst_7 = arith.constant dense<0.000000e+00> : vector<64xf32>
    %32 = vector.multi_reduction <add>, %31, %cst_7 [1] : vector<64x256xf32> to vector<64xf32>
    %33 = vector.shape_cast %32 : vector<64xf32> to vector<64x1xf32>
    %cst_8 = arith.constant 1.000000e-30 : f32
    %34 = vector.broadcast %cst_8 : f32 to vector<64x1xf32>
    %35 = arith.maximumf %33, %34 : vector<64x1xf32>
    %36 = tpu.reciprocal %35 {approx = true} : vector<64x1xf32> -> vector<64x1xf32>
    %37 = arith.mulf %35, %36 : vector<64x1xf32>
    %cst_9 = arith.constant 2.000000e+00 : f32
    %38 = vector.broadcast %cst_9 : f32 to vector<64x1xf32>
    %39 = arith.subf %38, %37 : vector<64x1xf32>
    %40 = arith.mulf %36, %39 : vector<64x1xf32>
    %cst_10 = arith.constant 0.000000e+00 : f32
    %41 = vector.broadcast %cst_10 : f32 to vector<64x1xf32>
    %42 = arith.cmpf ogt, %23, %41 : vector<64x1xf32>
    %43 = vector.broadcast %40 : vector<64x1xf32> to vector<64x256xf32>
    %44 = arith.mulf %31, %43 : vector<64x256xf32>
    %45 = vector.shape_cast %42 : vector<64x1xi1> to vector<64x1xi1>
    %46 = vector.broadcast %45 : vector<64x1xi1> to vector<64x256xi1>
    %47 = arith.select %46, %44, %21 : vector<64x256xi1>, vector<64x256xf32>
    %c0_11 = arith.constant 0 : index
    %c0_12 = arith.constant 0 : index
    %48 = vector.load %arg2[%c0_11, %c0_12] : memref<64x256xf32, #tpu.memory_space<vmem>>, vector<64x256xf32>
    tpu.vector_store %arg2[%c0_11, %c0_12], %47 {strides = array<i32>} : memref<64x256xf32, #tpu.memory_space<vmem>>, vector<64x256xf32>,
    %49 = arith.mulf %18, %4 : vector<64x256xf32>
    %cst_13 = arith.constant dense<0.000000e+00> : vector<64xf32>
    %50 = vector.multi_reduction <add>, %49, %cst_13 [1] : vector<64x256xf32> to vector<64xf32>
    %51 = vector.shape_cast %50 : vector<64xf32> to vector<64x1xf32>
    %cst_14 = arith.constant -1.000000e+30 : f32
    %52 = vector.broadcast %cst_14 : f32 to vector<64x256xf32>
    %53 = arith.select %20, %18, %52 : vector<64x256xi1>, vector<64x256xf32>
    %cst_15 = arith.constant dense<0xFF800000> : vector<64xf32>
    %54 = vector.multi_reduction <maximumf>, %53, %cst_15 [1] : vector<64x256xf32> to vector<64xf32>
    %55 = vector.shape_cast %54 : vector<64xf32> to vector<64x1xf32>
    %56 = vector.broadcast %55 : vector<64x1xf32> to vector<64x256xf32>
    %57 = arith.subf %53, %56 : vector<64x256xf32>
    %58 = math.exp %57 : vector<64x256xf32>
    %59 = arith.mulf %58, %4 : vector<64x256xf32>
    %cst_16 = arith.constant dense<0.000000e+00> : vector<64xf32>
    %60 = vector.multi_reduction <add>, %59, %cst_16 [1] : vector<64x256xf32> to vector<64xf32>
    %61 = vector.shape_cast %60 : vector<64xf32> to vector<64x1xf32>
    %cst_17 = arith.constant 1.000000e-30 : f32
    %62 = vector.broadcast %cst_17 : f32 to vector<64x1xf32>
    %63 = arith.maximumf %61, %62 : vector<64x1xf32>
    %64 = tpu.reciprocal %63 {approx = true} : vector<64x1xf32> -> vector<64x1xf32>
    %65 = arith.mulf %63, %64 : vector<64x1xf32>
    %cst_18 = arith.constant 2.000000e+00 : f32
    %66 = vector.broadcast %cst_18 : f32 to vector<64x1xf32>
    %67 = arith.subf %66, %65 : vector<64x1xf32>
    %68 = arith.mulf %64, %67 : vector<64x1xf32>
    %cst_19 = arith.constant 0.000000e+00 : f32
    %69 = vector.broadcast %cst_19 : f32 to vector<64x1xf32>
    %70 = arith.cmpf ogt, %51, %69 : vector<64x1xf32>
    %71 = vector.broadcast %68 : vector<64x1xf32> to vector<64x256xf32>
    %72 = arith.mulf %59, %71 : vector<64x256xf32>
    %73 = vector.shape_cast %70 : vector<64x1xi1> to vector<64x1xi1>
    %74 = vector.broadcast %73 : vector<64x1xi1> to vector<64x256xi1>
    %75 = arith.select %74, %72, %49 : vector<64x256xi1>, vector<64x256xf32>
    %c0_20 = arith.constant 0 : index
    %c0_21 = arith.constant 0 : index
    %76 = vector.load %arg3[%c0_20, %c0_21] : memref<64x256xf32, #tpu.memory_space<vmem>>, vector<64x256xf32>
    tpu.vector_store %arg3[%c0_20, %c0_21], %75 {strides = array<i32>} : memref<64x256xf32, #tpu.memory_space<vmem>>, vector<64x256xf32>,
    return
  }
  func.func @transform_0(%arg0: i32) -> (i32, i32) {
    %c0_i32 = arith.constant 0 : i32
    %c0_i32_0 = arith.constant 0 : i32
    return %arg0, %c0_i32 : i32, i32
  }
  func.func @transform_1(%arg0: i32) -> (i32, i32) {
    %c0_i32 = arith.constant 0 : i32
    %c0_i32_0 = arith.constant 0 : i32
    return %arg0, %c0_i32 : i32, i32
  }
  func.func @transform_2(%arg0: i32) -> (i32, i32) {
    %c0_i32 = arith.constant 0 : i32
    %c0_i32_0 = arith.constant 0 : i32
    return %arg0, %c0_i32 : i32, i32
  }
}

</mosaic_0001>

<bundles_post_ra>
// kernel: tpu_custom_call.1
= control target key start
LH: loop header
LB: loop body
LE: loop exit
PB: predicated region body
PF: predicated region fallthrough
CT: control target
= control target key end

     0   :  { %8 = vsyncpa [#allocation3], 0  ;;  %s2764_s0 = inlined_call_operand.hbm [shape: f32[256,256], index: 0, kind: input, shape index: {}]   ;;  %s2765_s1 = inlined_call_operand.hbm [shape: f32[256,256], index: 1, kind: output, shape index: {0}]   ;;  %s2766_s2 = inlined_call_operand.hbm [shape: f32[256,256], index: 2, kind: output, shape index: {1}]  }
   0x1   :  { %10 = vsyncpa [#allocation3 + $0x1], 0 }
   0x2   :  { %11 = vsyncpa [#allocation4], 0 }
   0x3   :  { %13 = vsyncpa [#allocation4 + $0x1], 0 }
   0x4   :  { %14 = vsyncpa [#allocation7], 0 }
   0x5   :  { %16 = vsyncpa [#allocation7 + $0x1], 0  ;;  %s1487_s9 = smov 0   ;;  %s1489_s10 = smov 0  }
   0x6   :  { %s1491_s11 = smov 0   ;;  %s1493_s12 = smov 0  }
   0x7 LB: > { %s1508_s13 = sadd.s32 4294967295, %s1463_s12   ;;  %s1138_s14 = sadd.s32 4294967294, %s1463_s12   ;;  %s1463_s12 = sphi %s1493_s12, %s2911_s12   ;;  %s1459_s11 = sphi %s1491_s11, %s2910_s11   ;;  %s1455_s10 = sphi %s1489_s10, %s2909_s10   ;;  %s1451_s9 = sphi %s1487_s9, %s2908_s9  }
   0x8   : > { %s1512_s15 = sadd.s32 1, %s1463_s12   ;;  %s29_s16 = sadd.s32 1, %s1459_s11 }
   0x9   : > { %s26_s17 = ssub.s32 %s1463_s12, %s1512_s15  ;;  %p36_p0 = scmp.ne.s32.totalorder %s1459_s11, %s1455_s10 }
   0xa   : > { %p27_p1 = scmp.eq.s32.totalorder %s26_s17, 0  ;;  %p37_p2 = scmp.eq.s32.totalorder %s1463_s12, 0 }
   0xb   : > { %p42_p3 = scmp.ne.s32.totalorder %s1455_s10, %s1451_s9  ;;  %p43_p4 = scmp.eq.s32.totalorder %s1508_s13, 0 }
   0xc   : > { %s1524_s18 = scalar_select %p27_p1, %s1459_s11, %s29_s16  }
   0xd   : > { %p1526_p5 = por %p37_p2, %p36_p0  ;;  %p1530_p6 = por %p43_p4, %p42_p3 }
   0xe   : > { %p66_p7 = scmp.eq.s32.totalorder %s1508_s13, 3  ;;  %p72_p8 = scmp.eq.s32.totalorder %s1138_s14, 3 }
   0xf   : > { %p1198_p9 = scmp.lt.s32.totalorder %s1463_s12, 4  ;;  %s118_s23 = sand.u32 1, %s1459_s11  }
  0x10   : > { %p1536_p10 = por %p66_p7, %p36_p0  ;;  %p1540_p11 = por %p72_p8, %p42_p3 }
  0x11   : > { %s1176_s24 = sshll.u32 %s1463_s12, 7  ;;  %s1141_s25 = sshll.u32 %s118_s23, 7 }
  0x12   : > { %s128_s28 = scalar_lea.hbm %s2764_s0, %s1176_s24  ;;  %s122_s30 = scalar_lea.vmem [#allocation2], %s1141_s25 }
  0x13   : > { %s129_s29 = sshll.u32 %s128_s28, 4  ;;  %s131_s3 = sshll.u32 %s122_s30, 4  ;;  %s130_s29 = int_to_ptr.hbm [resolvable:$true] %s129_s29  ;;  %s132_s3 = int_to_ptr.vmem [resolvable:$true] %s131_s3 }
  0x14   : > { %p1551_p12 = pnand %p1198_p9, %p1526_p5  ;;  %p1145_p13 = scmp.ge.s32.totalorder %s1463_s12, 1 }
  0x15   : > { %p139_p0 = scmp.lt.s32.totalorder %s1463_s12, 5  ;;  %s119_s5 = scalar_lea.sflag [#allocation3], %s118_s23 }
  0x16   : > { %s1335_s6 = sshra.s32 %s130_s29, 4  ;;  %p1339_p2 = pneg %p1551_p12  ;;  %s1336_s6 = int_to_ptr.hbm [resolvable:$true] %s1335_s6 }
  0x17   : > { %s1337_s7 = scalar_lea.hbm %s1336_s6, 128  ;;  %s1342_s16 = scalar_lea.hbm %s2764_s0, 512 }
  0x18   : > { %p1338_p1 = scmp.ne.s32.totalorder %s1336_s6, %s1337_s7  ;;  %p1343_p5 = scmp.lt.s32.totalorder %s1336_s6, %s2764_s0 }
  0x19   : > { %p1344_p7 = scmp.lt.s32.totalorder %s1342_s16, %s1337_s7 }
  0x1a   : > { %p1340_p3 = pnand %p1339_p2, %p1338_p1 }
  0x1b   : > { %p1345_p8 = por %p1344_p7, %p1343_p5 }
  0x1c   : > { %p1341_p4 = pneg %p1340_p3 }
  0x1e   : > { %p1346_p9 = pnand %p1345_p8, %p1341_p4 }
  0x20   : > { %1349 = shalt.err (!%p1346_p9)
}
  0x21   : > { %s1465_s23 = smov 256   ;;  %s1466_s24 = smov 16  }
  0x22   : > { %1190 = dma.hbm_to_vmem [thread:$0]  (!%p1551_p12), %s130_s29, 2048, %s132_s3, %s119_s5, %s1465_s23, %s1465_s23, %s1466_s24  }
  0x23   : > { %p140_p1 = pnand %p1145_p13, %p139_p0 }
  0x25   : > { %143 = sbr.rel (%p140_p1) target bundleno = 575 (0x23f), region = 24 }
  0x2a   : > { %s1572_s25 = sand.u32 1, %s1455_s10  }
  0x2b   : > { %s1575_s26 = sshll.u32 %s1572_s25, 7  ;;  %s146_s27 = scalar_lea.sflag [#allocation3], %s1572_s25 }
  0x2c   : > { %s1579_s28 = scalar_lea.vmem [#allocation2], %s1575_s26 }
  0x2d   : > { %1438 = dma.done.wait (%p1530_p6), %s146_s27, 2048  }
  0x2e   : > { %1440 = vsyncadd (%p1530_p6), %s146_s27, 4294965248  ;;  %v1586_v0 = vld [vmem:[%s1579_s28 + $0x20] sm:$0xff]  ;;  %s1467_s29 = smov 127   ;;  %v1601_v3 = vld [vmem:[%s1579_s28 + $0x30] sm:$0xff]  ;;  %s1468_s20 = smov 1   ;;  %v243_v18 = vlaneseq  ;;  %v2767_v60 = vmov 0.0  }
  0x2f   : > { %v1589_v1 = vld [vmem:[%s1579_s28] sm:$0xff]  ;;  %254 = vrot.lane.b32.xlu1 %v1586_v0, %s1467_s29  ;;  %v1604_v4 = vld [vmem:[%s1579_s28 + $0x10] sm:$0xff]  ;;  %v1622_v8 = vld [vmem:[%s1579_s28 + $0x8] sm:$0xff]  ;;  %vm199_vm4 = vcmp.ne.f32.partialorder %v1586_v0, 0.0  ;;  %vm201_vm12 = vcmp.ne.f32.partialorder %v1601_v3, 0.0  ;;  %s2571_s30 = scalar_lea.vmem [#allocation5], %s1575_s26 }
  0x30   : > { %v1592_v2 = vld [vmem:[%s1579_s28 + $0x40] sm:$0xff]  ;;  %250 = vrot.lane.b32.xlu0 %v1589_v1, %s1467_s29  ;;  %v1607_v5 = vld [vmem:[%s1579_s28 + $0x50] sm:$0xff]  ;;  %v1631_v9 = vld [vmem:[%s1579_s28 + $0x28] sm:$0xff]  ;;  %v1685_v20 = vand.u32 127, %v243_v18  ;;  %v1752_v61 = vsel %vm199_vm4, 1.0, %v2767_v60  ;;  %vm197_vm6 = vcmp.ne.f32.partialorder %v1604_v4, 0.0 }
  0x31   : > { %258 = vrot.lane.b32.xlu2 %v1592_v2, %s1467_s29  ;;  %v1616_v6 = vld [vmem:[%s1579_s28 + $0x70] sm:$0xff]  ;;  %v1619_v7 = vld [vmem:[%s1579_s28 + $0x60] sm:$0xff]  ;;  %v1634_v10 = vld [vmem:[%s1579_s28 + $0x18] sm:$0xff]  ;;  %vm200_vm5 = vcmp.ne.f32.partialorder %v1631_v9, 0.0  ;;  %vm205_vm8 = vcmp.ne.f32.partialorder %v1607_v5, 0.0  ;;  %vm195_vm10 = vcmp.ne.f32.partialorder %v1589_v1, 0.0 }
  0x32   : > { %v1637_v11 = vld [vmem:[%s1579_s28 + $0x38] sm:$0xff]  ;;  %v1649_v13 = vld [vmem:[%s1579_s28 + $0x48] sm:$0xff]  ;;  %vm282_vm0 = vcmp.lt.s32.totalorder %v1685_v20, 127  ;;  %v245_v42 = vadd.s32 128, %v1685_v20  ;;  %v246_v45 = vand.u32 1, %v1685_v20  ;;  %vm331_vm1 = vcmp.lt.s32.totalorder %v1685_v20, 1 }
  0x33   : > { %v1646_v12 = vld [vmem:[%s1579_s28 + $0x58] sm:$0xff]  ;;  %v1652_v14 = vld [vmem:[%s1579_s28 + $0x68] sm:$0xff]  ;;  %v1755_v62 = vsel %vm200_vm5, 1.0, %v2767_v60  ;;  %vm198_vm7 = vcmp.ne.f32.partialorder %v1634_v10, 0.0  ;;  %vm196_vm11 = vcmp.ne.f32.partialorder %v1622_v8, 0.0  ;;  %vm202_vm13 = vcmp.ne.f32.partialorder %v1637_v11, 0.0 }
  0x34   : > { %v1661_v15 = vld [vmem:[%s1579_s28 + $0x78] sm:$0xff]  ;;  %v247_v46 = vand.u32 1, %v245_v42  ;;  %vm1725_vm2 = vcmp.eq.s32.totalorder %v246_v45, 0  ;;  %vm206_vm9 = vcmp.ne.f32.partialorder %v1646_v12, 0.0  ;;  %vm203_vm14 = vcmp.ne.f32.partialorder %v1592_v2, 0.0  ;;  %s1178_s3 = sshll.u32 %s1508_s13, 7 }
  0x35   : > { %vm204_vm15 = vcmp.ne.f32.partialorder %v1649_v13, 0.0  ;;  %vm207_vm4 = vcmp.ne.f32.partialorder %v1619_v7, 0.0  ;;  %vm208_vm5 = vcmp.ne.f32.partialorder %v1652_v14, 0.0  ;;  %s2623_s6 = scalar_lea.hbm %s2765_s1, %s1178_s3  ;;  %s1011_s7 = sshll.u32 %s2571_s30, 4  ;;  %s2653_s7 = int_to_ptr.vmem [resolvable:$true] %s1011_s7 }
  0x36   : > { %vm1729_vm3 = vcmp.eq.s32.totalorder %v247_v46, 0  ;;  %v1788_v46 = vsel %vm197_vm6, 1.0, %v2767_v60  ;;  %s1013_s8 = sshll.u32 %s2623_s6, 4  ;;  %s2658_s14 = scalar_lea.vmem [#allocation6], %s1575_s26  ;;  %s2655_s8 = int_to_ptr.hbm [resolvable:$true] %s1013_s8 }
  0x37   : > { %256 = vrot.lane.b32.xlu1 %v1601_v3, %s1467_s29  ;;  %vm418_vm6 = vcmp.gt.f32.partialorder %v1788_v46, 0.0  ;;  %s993_s16 = scalar_lea.sflag [#allocation4], %s1572_s25  ;;  %s1379_s17 = sshra.s32 %s2655_s8, 4  ;;  %s1380_s17 = int_to_ptr.hbm [resolvable:$true] %s1379_s17 }
  0x38   : > { %252 = vrot.lane.b32.xlu0 %v1604_v4, %s1467_s29  ;;  %s1381_s19 = scalar_lea.hbm %s1380_s17, 128  ;;  %s1385_s26 = scalar_lea.hbm %s2765_s1, 512 }
  0x39   : > { %260 = vrot.lane.b32.xlu2 %v1607_v5, %s1467_s29  ;;  %p1382_p6 = scmp.ne.s32.totalorder %s1380_s17, %s1381_s19  ;;  %p1386_p0 = scmp.lt.s32.totalorder %s1380_s17, %s2765_s1 }
  0x3a   : > { %p1387_p2 = scmp.lt.s32.totalorder %s1385_s26, %s1381_s19 }
  0x3b   : > { %p1383_p12 = pnand %p1382_p6, %p1536_p10 }
  0x3c   : > { %p1388_p3 = por %p1387_p2, %p1386_p0 }
  0x3d   : > { %p1384_p13 = pneg %p1383_p12 }
  0x3f   : > { %264 = vrot.lane.b32.xlu1 %v1616_v6, %s1467_s29  ;;  %p1389_p4 = pnand %p1388_p3, %p1384_p13 }
  0x40   : > { %262 = vrot.lane.b32.xlu0 %v1619_v7, %s1467_s29 }
  0x41   : > { %266 = vrot.lane.b32.xlu2 %v1622_v8, %s1467_s29 }
  0x47   : > { %270 = vrot.lane.b32.xlu1 %v1631_v9, %s1467_s29 }
  0x48   : > { %268 = vrot.lane.b32.xlu0 %v1634_v10, %s1467_s29 }
  0x49   : > { %272 = vrot.lane.b32.xlu2 %v1637_v11, %s1467_s29 }
  0x4f   : > { %276 = vrot.lane.b32.xlu1 %v1646_v12, %s1467_s29 }
  0x50   : > { %274 = vrot.lane.b32.xlu0 %v1649_v13, %s1467_s29 }
  0x51   : > { %278 = vrot.lane.b32.xlu2 %v1652_v14, %s1467_s29 }
  0x57   : > { %299 = vrot.lane.b32.xlu1 %v1589_v1, %s1468_s20 }
  0x58   : > { %280 = vrot.lane.b32.xlu0 %v1661_v15, %s1467_s29 }
  0x59   : > { %301 = vrot.lane.b32.xlu2 %v1604_v4, %s1468_s20 }
  0x5f   : > { %305 = vrot.lane.b32.xlu1 %v1601_v3, %s1468_s20 }
  0x60   : > { %303 = vrot.lane.b32.xlu0 %v1586_v0, %s1468_s20 }
  0x61   : > { %307 = vrot.lane.b32.xlu2 %v1592_v2, %s1468_s20 }
  0x67   : > { %311 = vrot.lane.b32.xlu1 %v1619_v7, %s1468_s20 }
  0x68   : > { %309 = vrot.lane.b32.xlu0 %v1607_v5, %s1468_s20 }
  0x69   : > { %313 = vrot.lane.b32.xlu2 %v1616_v6, %s1468_s20 }
  0x6f   : > { %317 = vrot.lane.b32.xlu1 %v1634_v10, %s1468_s20 }
  0x70   : > { %315 = vrot.lane.b32.xlu0 %v1622_v8, %s1468_s20 }
  0x71   : > { %319 = vrot.lane.b32.xlu2 %v1631_v9, %s1468_s20 }
  0x77   : > { %323 = vrot.lane.b32.xlu1 %v1649_v13, %s1468_s20 }
  0x78   : > { %321 = vrot.lane.b32.xlu0 %v1637_v11, %s1468_s20 }
  0x79   : > { %325 = vrot.lane.b32.xlu2 %v1646_v12, %s1468_s20 }
  0x7f   : > { %329 = vrot.lane.b32.xlu1 %v1661_v15, %s1468_s20 }
  0x80   : > { %327 = vrot.lane.b32.xlu0 %v1652_v14, %s1468_s20 }
  0x8b   : > { %v1681_v16 = vpop.permute.xlu2 %258 }
  0x93   : > { %v1683_v17 = vpop.permute.xlu2 %260 }
  0x9b   : > { %v267_v19 = vpop.permute.xlu2 %266 }
  0xa1   : > { %v255_v21 = vpop.permute.xlu1 %254 }
  0xa2   : > { %v251_v22 = vpop.permute.xlu0 %250 }
  0xa3   : > { %v1690_v23 = vsel %vm282_vm0, %v251_v22, %v267_v19  ;;  %v1694_v24 = vsel %vm282_vm0, %v267_v19, %v251_v22  ;;  %v273_v25 = vpop.permute.xlu2 %272 }
  0xa9   : > { %v257_v26 = vpop.permute.xlu1 %256 }
  0xaa   : > { %v253_v27 = vpop.permute.xlu0 %252  ;;  %v1698_v28 = vsel %vm282_vm0, %v257_v26, %v273_v25  ;;  %v1702_v29 = vsel %vm282_vm0, %v273_v25, %v257_v26 }
  0xab   : > { %v279_v30 = vpop.permute.xlu2 %278 }
  0xb1   : > { %v1704_v31 = vpop.permute.xlu1 %264 }
  0xb2   : > { %v263_v32 = vpop.permute.xlu0 %262 }
  0xb3   : > { %v1708_v33 = vsel %vm282_vm0, %v263_v32, %v279_v30  ;;  %v1712_v34 = vsel %vm282_vm0, %v279_v30, %v263_v32  ;;  %v302_v35 = vpop.permute.xlu2 %301 }
  0xb9   : > { %v271_v36 = vpop.permute.xlu1 %270 }
  0xba   : > { %v269_v37 = vpop.permute.xlu0 %268  ;;  %v285_v52 = vsel %vm282_vm0, %v255_v21, %v271_v36  ;;  %v293_v53 = vsel %vm282_vm0, %v271_v36, %v255_v21 }
  0xbb   : > { %v1714_v38 = vpop.permute.xlu2 %307  ;;  %v284_v32 = vsel %vm282_vm0, %v253_v27, %v269_v37  ;;  %v292_v36 = vsel %vm282_vm0, %v269_v37, %v253_v27 }
  0xc1   : > { %v277_v39 = vpop.permute.xlu1 %276 }
  0xc2   : > { %v1716_v40 = vpop.permute.xlu0 %274  ;;  %v288_v42 = vsel %vm282_vm0, %v1683_v17, %v277_v39  ;;  %v296_v45 = vsel %vm282_vm0, %v277_v39, %v1683_v17 }
  0xc3   : > { %v1718_v41 = vpop.permute.xlu2 %313 }
  0xc9   : > { %v300_v43 = vpop.permute.xlu1 %299 }
  0xca   : > { %v1721_v44 = vpop.permute.xlu0 %280 }
  0xcb   : > { %v320_v47 = vpop.permute.xlu2 %319 }
  0xd1   : > { %v1733_v50 = vpop.permute.xlu1 %305 }
  0xd2   : > { %v304_v51 = vpop.permute.xlu0 %303 }
  0xd3   : > { %v334_v54 = vsel %vm331_vm1, %v304_v51, %v320_v47  ;;  %v342_v55 = vsel %vm331_vm1, %v320_v47, %v304_v51  ;;  %v326_v30 = vpop.permute.xlu2 %325  ;;  %v1791_v47 = vsel %vm198_vm7, 1.0, %v2767_v60 }
  0xd4   : > { %v356_v56 = vsel %vm1725_vm2, %v285_v52, %v342_v55  ;;  %v357_v57 = vsel %vm1729_vm3, %v293_v53, %v334_v54  ;;  %vm419_vm7 = vcmp.gt.f32.partialorder %v1791_v47, 0.0 }
  0xd5   : > { %v372_v58 = vadd.f32 %v356_v56, %v1586_v0  ;;  %v373_v59 = vadd.f32 %v357_v57, %v1631_v9 }
  0xd7   : > { %v1757_v63 = vmul.f32 0.5, %v372_v58  ;;  %v1759_v18 = vmul.f32 0.5, %v373_v59 }
  0xd9   : > { %v1763_v19 = vmul.f32 %v1752_v61, %v1757_v63  ;;  %v1767_v21 = vmul.f32 %v1755_v62, %v1759_v18  ;;  %v1769_v22 = vpop.permute.xlu1 %311 }
  0xda   : > { %v310_v25 = vpop.permute.xlu0 %309 }
  0xdb   : > { %2817 = vst [vmem:[#allocation11_spill] sm:$0xff] %v1763_v19  ;;  %v454_v26 = vadd.f32 %v1767_v21, %v1763_v19  ;;  %v337_v27 = vsel %vm331_vm1, %v310_v25, %v326_v30  ;;  %v345_v37 = vsel %vm331_vm1, %v326_v30, %v310_v25 }
  0xdc   : > { %2818 = vst [vmem:[#allocation12_spill] sm:$0xff] %v1767_v21  ;;  %v363_v30 = vsel %vm1729_vm3, %v296_v45, %v337_v27  ;;  %v1846_v45 = vsel %vm205_vm8, 1.0, %v2767_v60  ;;  %v1851_v27 = vsel %vm206_vm9, 1.0, %v2767_v60 }
  0xdd   : > { %455 = vadd.xlane.f32.xlu1 %v454_v26  ;;  %v362_v26 = vsel %vm1725_vm2, %v288_v42, %v345_v37  ;;  %v287_v37 = vsel %vm282_vm0, %v1681_v16, %v1716_v40 }
  0xe1   : > { %v318_v51 = vpop.permute.xlu1 %317 }
  0xe2   : > { %v316_v52 = vpop.permute.xlu0 %315  ;;  %v333_v17 = vsel %vm331_vm1, %v302_v35, %v318_v51  ;;  %v341_v39 = vsel %vm331_vm1, %v318_v51, %v302_v35 }
  0xe3   : > { %v332_v53 = vsel %vm331_vm1, %v300_v43, %v316_v52  ;;  %v340_v54 = vsel %vm331_vm1, %v316_v52, %v300_v43  ;;  %v354_v55 = vsel %vm1725_vm2, %v284_v32, %v341_v39  ;;  %v355_v56 = vsel %vm1729_vm3, %v292_v36, %v333_v17 }
  0xe4   : > { %v352_v57 = vsel %vm1725_vm2, %v1690_v23, %v340_v54  ;;  %v353_v35 = vsel %vm1729_vm3, %v1694_v24, %v332_v53  ;;  %v370_v58 = vadd.f32 %v354_v55, %v1604_v4  ;;  %v371_v59 = vadd.f32 %v355_v56, %v1634_v10 }
  0xe5   : > { %v368_v43 = vadd.f32 %v352_v57, %v1589_v1  ;;  %v369_v25 = vadd.f32 %v353_v35, %v1622_v8  ;;  %v1828_v23 = vsel %vm195_vm10, 1.0, %v2767_v60  ;;  %v1833_v24 = vsel %vm196_vm11, 1.0, %v2767_v60 }
  0xe6   : > { %v1835_v32 = vmul.f32 0.5, %v370_v58  ;;  %v1837_v36 = vmul.f32 0.5, %v371_v59  ;;  %v295_v52 = vsel %vm282_vm0, %v1716_v40, %v1681_v16  ;;  %v378_v17 = vadd.f32 %v362_v26, %v1607_v5 }
  0xe7   : > { %v1839_v51 = vmul.f32 0.5, %v368_v43  ;;  %v1841_v42 = vmul.f32 0.5, %v369_v25  ;;  %v379_v39 = vadd.f32 %v363_v30, %v1646_v12 }
  0xe8   : > { %v1865_v55 = vmul.f32 %v1788_v46, %v1835_v32  ;;  %v1869_v56 = vmul.f32 %v1791_v47, %v1837_v36  ;;  %v1899_v25 = vmul.f32 0.5, %v378_v17 }
  0xe9   : > { %v324_v53 = vpop.permute.xlu1 %323  ;;  %v1873_v57 = vmul.f32 %v1828_v23, %v1839_v51  ;;  %v1877_v16 = vmul.f32 %v1833_v24, %v1841_v42  ;;  %v1901_v26 = vmul.f32 0.5, %v379_v39 }
  0xea   : > { %v322_v54 = vpop.permute.xlu0 %321  ;;  %2819 = vst [vmem:[#allocation13_spill] sm:$0xff] %v1865_v55  ;;  %v336_v58 = vsel %vm331_vm1, %v1714_v38, %v324_v53  ;;  %v344_v59 = vsel %vm331_vm1, %v324_v53, %v1714_v38  ;;  %v451_v60 = vadd.f32 %v1869_v56, %v1865_v55  ;;  %v2823_v53 = vmov 0.0  }
  0xeb   : > { %2820 = vst [vmem:[#allocation14_spill] sm:$0xff] %v1869_v56  ;;  %v335_v40 = vsel %vm331_vm1, %v1733_v50, %v322_v54  ;;  %v343_v35 = vsel %vm331_vm1, %v322_v54, %v1733_v50  ;;  %v448_v38 = vadd.f32 %v1877_v16, %v1873_v57  ;;  %v361_v17 = vsel %vm1729_vm3, %v295_v52, %v336_v58 }
  0xec   : > { %2821 = vst [vmem:[#allocation15_spill] sm:$0xff] %v1873_v57  ;;  %v358_v43 = vsel %vm1725_vm2, %v1698_v28, %v343_v35  ;;  %v359_v50 = vsel %vm1729_vm3, %v1702_v29, %v335_v40  ;;  %v1910_v28 = vsel %vm201_vm12, 1.0, %v2823_v53  ;;  %v1913_v35 = vsel %vm202_vm13, 1.0, %v2823_v53  ;;  %452 = vadd.xlane.f32.xlu0 %v451_v60 }
  0xed   : > { %2822 = vst [vmem:[#allocation16_spill] sm:$0xff] %v1877_v16  ;;  %v374_v30 = vadd.f32 %v358_v43, %v1601_v3  ;;  %v375_v54 = vadd.f32 %v359_v50, %v1637_v11  ;;  %v360_v29 = vsel %vm1725_vm2, %v287_v37, %v344_v59  ;;  %v290_v43 = vsel %vm282_vm0, %v1704_v31, %v1721_v44 }
  0xee   : > { %v298_v50 = vsel %vm282_vm0, %v1721_v44, %v1704_v31  ;;  %449 = vadd.xlane.f32.xlu2 %v448_v38  ;;  %v1935_v37 = vmul.f32 %v1846_v45, %v1899_v25  ;;  %v1939_v52 = vmul.f32 %v1851_v27, %v1901_v26  ;;  %v376_v31 = vadd.f32 %v360_v29, %v1592_v2 }
  0xef   : > { %v1919_v39 = vmul.f32 0.5, %v374_v30  ;;  %v1921_v40 = vmul.f32 0.5, %v375_v54  ;;  %v377_v44 = vadd.f32 %v361_v17, %v1649_v13  ;;  %v1960_v29 = vsel %vm203_vm14, 1.0, %v2823_v53 }
  0xf0   : > { %2824 = vst [vmem:[#allocation17_spill] sm:$0xff] %v1935_v37  ;;  %v1963_v17 = vsel %vm204_vm15, 1.0, %v2823_v53  ;;  %v1982_v16 = vsel %vm207_vm4, 1.0, %v2823_v53  ;;  %v1987_v20 = vsel %vm208_vm5, 1.0, %v2823_v53  ;;  %vm416_vm0 = vcmp.gt.f32.partialorder %v1828_v23, 0.0 }
  0xf1   : > { %2825 = vst [vmem:[#allocation18_spill] sm:$0xff] %v1939_v52  ;;  %v330_v60 = vpop.permute.xlu1 %329  ;;  %v1947_v59 = vmul.f32 %v1910_v28, %v1919_v39  ;;  %v1951_v30 = vmul.f32 %v1913_v35, %v1921_v40  ;;  %vm422_vm8 = vcmp.gt.f32.partialorder %v1910_v28, 0.0  ;;  %vm423_vm9 = vcmp.gt.f32.partialorder %v1913_v35, 0.0 }
  0xf2   : > { %v328_v58 = vpop.permute.xlu0 %327  ;;  %v339_v21 = vsel %vm331_vm1, %v1718_v41, %v330_v60  ;;  %v347_v19 = vsel %vm331_vm1, %v330_v60, %v1718_v41  ;;  %v1989_v41 = vmul.f32 0.5, %v376_v31  ;;  %vm424_vm10 = vcmp.gt.f32.partialorder %v1960_v29, 0.0 }
  0xf3   : > { %2826 = vst [vmem:[#allocation19_spill] sm:$0xff] %v1947_v59  ;;  %v338_v54 = vsel %vm331_vm1, %v1769_v22, %v328_v58  ;;  %v346_v38 = vsel %vm331_vm1, %v328_v58, %v1769_v22  ;;  %v366_v60 = vsel %vm1725_vm2, %v290_v43, %v347_v19  ;;  %vm417_vm1 = vcmp.gt.f32.partialorder %v1833_v24, 0.0 }
  0xf4   : > { %2827 = vst [vmem:[#allocation20_spill] sm:$0xff] %v1951_v30  ;;  %v364_v56 = vsel %vm1725_vm2, %v1708_v33, %v346_v38  ;;  %v365_v22 = vsel %vm1729_vm3, %v1712_v34, %v338_v54  ;;  %v1991_v33 = vmul.f32 0.5, %v377_v44  ;;  %v463_v34 = vadd.f32 %v1939_v52, %v1935_v37 }
  0xf5   : > { %v380_v58 = vadd.f32 %v364_v56, %v1619_v7  ;;  %v381_v55 = vadd.f32 %v365_v22, %v1652_v14  ;;  %v457_v56 = vadd.f32 %v1951_v30, %v1947_v59  ;;  %v367_v54 = vsel %vm1729_vm3, %v298_v50, %v339_v21 }
  0xf6   : > { %464 = vadd.xlane.f32.xlu0 %v463_v34  ;;  %v382_v49 = vadd.f32 %v366_v60, %v1616_v6  ;;  %v383_v19 = vadd.f32 %v367_v54, %v1661_v15  ;;  %v2019_v21 = vmul.f32 %v1960_v29, %v1989_v41  ;;  %v2030_v50 = vsel %vm416_vm0, %v1839_v51, -1e+30 }
  0xf7   : > { %v2001_v38 = vmul.f32 0.5, %v380_v58  ;;  %v2003_v22 = vmul.f32 0.5, %v381_v55  ;;  %458 = vadd.xlane.f32.xlu2 %v457_v56  ;;  %v2023_v55 = vmul.f32 %v1963_v17, %v1991_v33  ;;  %v2035_v44 = vsel %vm417_vm1, %v1841_v42, -1e+30 }
  0xf8   : > { %2830 = vst [vmem:[#allocation23_spill] sm:$0xff] %v2019_v21  ;;  %vm209_vm2 = vcmp.ne.f32.partialorder %v1616_v6, 0.0  ;;  %vm210_vm3 = vcmp.ne.f32.partialorder %v1661_v15, 0.0  ;;  %v2041_v58 = vmul.f32 0.5, %v382_v49  ;;  %v2043_v34 = vmul.f32 0.5, %v383_v19 }
  0xf9   : > { %v2009_v31 = vmul.f32 %v1982_v16, %v2001_v38  ;;  %v2013_v48 = vmul.f32 %v1987_v20, %v2003_v22  ;;  %2831 = vst [vmem:[#allocation24_spill] sm:$0xff] %v2023_v55  ;;  %v460_v56 = vadd.f32 %v2023_v55, %v2019_v21  ;;  %v488_v60 = vmax.f32 %v2030_v50, %v2035_v44 }
  0xfa   : > { %v2050_v54 = vsel %vm209_vm2, 1.0, %v2823_v53  ;;  %v2053_v52 = vsel %vm210_vm3, 1.0, %v2823_v53  ;;  %v2058_v49 = vsel %vm418_vm6, %v1835_v32, -1e+30  ;;  %v2063_v19 = vsel %vm419_vm7, %v1837_v36, -1e+30 }
  0xfb   : > { %2828 = vst [vmem:[#allocation21_spill] sm:$0xff] %v2009_v31  ;;  %v466_v43 = vadd.f32 %v2013_v48, %v2009_v31  ;;  %v2069_v53 = vmul.f32 %v2050_v54, %v2041_v58  ;;  %v2085_v37 = vsel %vm423_vm9, %v1921_v40, -1e+30  ;;  %vm425_vm11 = vcmp.gt.f32.partialorder %v1963_v17, 0.0 }
  0xfc   : > { %2829 = vst [vmem:[#allocation22_spill] sm:$0xff] %v2013_v48  ;;  %vm420_vm12 = vcmp.gt.f32.partialorder %v1752_v61, 0.0  ;;  %vm421_vm13 = vcmp.gt.f32.partialorder %v1755_v62, 0.0  ;;  %v2103_v55 = vsel %vm425_vm11, %v1991_v33, -1e+30  ;;  %vm428_vm14 = vcmp.gt.f32.partialorder %v1982_v16, 0.0 }
  0xfd   : > { %467 = vadd.xlane.f32.xlu1 %v466_v43  ;;  %2832 = vst [vmem:[#allocation25_spill] sm:$0xff] %v2069_v53  ;;  %v2073_v43 = vmul.f32 %v2053_v52, %v2043_v34  ;;  %vm429_vm15 = vcmp.gt.f32.partialorder %v1987_v20, 0.0  ;;  %vm430_vm4 = vcmp.gt.f32.partialorder %v2050_v54, 0.0  ;;  %vm431_vm5 = vcmp.gt.f32.partialorder %v2053_v52, 0.0 }
  0xfe   : > { %489 = vmax.xlane.f32.xlu0 %v488_v60  ;;  %v2080_v60 = vsel %vm422_vm8, %v1919_v39, -1e+30  ;;  %2834 = vst [vmem:[#allocation27_spill] sm:$0xff] %v2103_v55  ;;  %v2127_v21 = vsel %vm429_vm15, %v2003_v22, -1e+30  ;;  %vm426_vm2 = vcmp.gt.f32.partialorder %v1846_v45, 0.0  ;;  %v402_v57 = vsub.f32 %v1604_v4, %v1835_v32 }
  0xff   : > { %461 = vadd.xlane.f32.xlu2 %v460_v56  ;;  %2833 = vst [vmem:[#allocation26_spill] sm:$0xff] %v2073_v43  ;;  %v491_v56 = vmax.f32 %v2058_v49, %v2063_v19  ;;  %v469_v48 = vadd.f32 %v2073_v43, %v2069_v53  ;;  %v497_v31 = vmax.f32 %v2080_v60, %v2085_v37  ;;  %v2110_v43 = vsel %vm420_vm12, %v1757_v63, -1e+30 }
 0x100   : > { %2835 = vst [vmem:[#allocation28_spill] sm:$0xff] %v2110_v43  ;;  %v2122_v53 = vsel %vm428_vm14, %v2001_v38, -1e+30  ;;  %vm427_vm3 = vcmp.gt.f32.partialorder %v1851_v27, 0.0  ;;  %v2154_v4 = vsel %vm426_vm2, %v1899_v25, -1e+30 }
 0x101   : > { %2837 = vst [vmem:[#allocation30_spill] sm:$0xff] %v2122_v53  ;;  %v506_v59 = vmax.f32 %v2122_v53, %v2127_v21  ;;  %v2161_v32 = vsel %vm427_vm3, %v1901_v26, -1e+30  ;;  %v400_v53 = vsub.f32 %v1589_v1, %v1839_v51 }
 0x102   : > { %2838 = vst [vmem:[#allocation31_spill] sm:$0xff] %v2127_v21 }
 0x105   : > { %492 = vmax.xlane.f32.xlu1 %v491_v56  ;;  %v2098_v56 = vsel %vm424_vm10, %v1989_v41, -1e+30 }
 0x106   : > { %498 = vmax.xlane.f32.xlu0 %v497_v31  ;;  %v500_v31 = vmax.f32 %v2098_v56, %v2103_v55  ;;  %v403_v55 = vsub.f32 %v1634_v10, %v1837_v36  ;;  %v2165_v36 = vsel %vm418_vm6, %v402_v57, -1e+30 }
 0x107   : > { %470 = vadd.xlane.f32.xlu2 %v469_v48  ;;  %v2117_v48 = vsel %vm421_vm13, %v1759_v18, -1e+30 }
 0x108   : > { %2836 = vst [vmem:[#allocation29_spill] sm:$0xff] %v2117_v48  ;;  %v494_v30 = vmax.f32 %v2110_v43, %v2117_v48  ;;  %v2148_v48 = vsel %vm431_vm5, %v2043_v34, -1e+30  ;;  %v401_v43 = vsub.f32 %v1622_v8, %v1841_v42  ;;  %v2227_v42 = vsub.f32 %v1607_v5, %v1899_v25 }
 0x109   : > { %2840 = vst [vmem:[#allocation33_spill] sm:$0xff] %v2148_v48  ;;  %v2247_v5 = vsub.f32 %v1616_v6, %v2041_v58 }
 0x10a   : > { %2841 = vst [vmem:[#allocation34_spill] sm:$0xff] %v2227_v42  ;;  %v2256_v25 = vsel %vm426_vm2, %v2227_v42, -1e+30 }
 0x10b   : > { %2843 = vst [vmem:[#allocation36_spill] sm:$0xff] %v2247_v5 }
 0x10d   : > { %501 = vmax.xlane.f32.xlu1 %v500_v31  ;;  %v2143_v31 = vsel %vm430_vm4, %v2041_v58, -1e+30 }
 0x10e   : > { %507 = vmax.xlane.f32.xlu0 %v506_v59  ;;  %2839 = vst [vmem:[#allocation32_spill] sm:$0xff] %v2143_v31  ;;  %v509_v10 = vmax.f32 %v2143_v31, %v2148_v48  ;;  %v2169_v59 = vsel %vm419_vm7, %v403_v55, -1e+30  ;;  %v2177_v48 = vsub.f32 %v1631_v9, %v1759_v18  ;;  %v503_v31 = vmax.f32 %v2154_v4, %v2161_v32 }
 0x10f   : > { %495 = vmax.xlane.f32.xlu2 %v494_v30  ;;  %v2173_v30 = vsub.f32 %v1586_v0, %v1757_v63  ;;  %v771_v21 = vmax.f32 %v2165_v36, %v2169_v59  ;;  %v2189_v0 = vsub.f32 %v1592_v2, %v1989_v41  ;;  %v2193_v9 = vsub.f32 %v1649_v13, %v1991_v33 }
 0x110   : > { %v2203_v1 = vsel %vm421_vm13, %v2177_v48, -1e+30  ;;  %v2207_v2 = vsel %vm416_vm0, %v400_v53, -1e+30  ;;  %v2213_v13 = vsel %vm417_vm1, %v401_v43, -1e+30  ;;  %v2231_v41 = vsub.f32 %v1646_v12, %v1901_v26 }
 0x111   : > { %v2198_v63 = vsel %vm420_vm12, %v2173_v30, -1e+30  ;;  %v2218_v18 = vsel %vm424_vm10, %v2189_v0, -1e+30  ;;  %v2223_v51 = vsel %vm425_vm11, %v2193_v9, -1e+30  ;;  %v768_v33 = vmax.f32 %v2207_v2, %v2213_v13 }
 0x112   : > { %v774_v8 = vmax.f32 %v2198_v63, %v2203_v1  ;;  %2842 = vst [vmem:[#allocation35_spill] sm:$0xff] %v2231_v41  ;;  %v2251_v12 = vsub.f32 %v1661_v15, %v2043_v34  ;;  %v2278_v26 = vsel %vm430_vm4, %v2247_v5, -1e+30  ;;  %v2291_v34 = vsub.f32 %v1619_v7, %v2001_v38 }
 0x113   : > { %v2318_v38 = vmul.f32 %v1828_v23, %v400_v53 }
 0x114   : > { %2844 = vst [vmem:[#allocation37_spill] sm:$0xff] %v2251_v12 }
 0x115   : > { %510 = vmax.xlane.f32.xlu1 %v509_v10  ;;  %v2243_v10 = vsub.f32 %v1637_v11, %v1921_v40  ;;  %2847 = vst [vmem:[#allocation40_spill] sm:$0xff] %v2318_v38 }
 0x116   : > { %772 = vmax.xlane.f32.xlu0 %v771_v21  ;;  %v780_v21 = vmax.f32 %v2218_v18, %v2223_v51 }
 0x117   : > { %504 = vmax.xlane.f32.xlu2 %v503_v31  ;;  %v2239_v31 = vsub.f32 %v1601_v3, %v1919_v39  ;;  %v2261_v3 = vsel %vm427_vm3, %v2231_v41, -1e+30  ;;  %v2273_v15 = vsel %vm423_vm9, %v2243_v10, -1e+30  ;;  %v2283_v39 = vsel %vm431_vm5, %v2251_v12, -1e+30 }
 0x118   : > { %v783_v11 = vmax.f32 %v2256_v25, %v2261_v3  ;;  %v789_v58 = vmax.f32 %v2278_v26, %v2283_v39  ;;  %v2863_v41 = vld [vmem:[#allocation31_spill] sm:$0xff] }
 0x119   : > { %v2266_v6 = vsel %vm422_vm8, %v2239_v31, -1e+30 }
 0x11a   : > { %v777_v40 = vmax.f32 %v2266_v6, %v2273_v15 }
 0x11d   : > { %775 = vmax.xlane.f32.xlu1 %v774_v8  ;;  %v2295_v8 = vsub.f32 %v1652_v14, %v2003_v22  ;;  %v2321_v22 = vmul.f32 %v1833_v24, %v401_v43 }
 0x11e   : > { %781 = vmax.xlane.f32.xlu0 %v780_v21  ;;  %v2301_v21 = vmul.f32 %v1791_v47, %v403_v55 }
 0x11f   : > { %769 = vmax.xlane.f32.xlu2 %v768_v33  ;;  %v2298_v33 = vmul.f32 %v1788_v46, %v402_v57  ;;  %v2311_v7 = vsel %vm429_vm15, %v2295_v8, -1e+30  ;;  %2848 = vst [vmem:[#allocation41_spill] sm:$0xff] %v2321_v22  ;;  %v728_v55 = vadd.f32 %v2321_v22, %v2318_v38 }
 0x120   : > { %2846 = vst [vmem:[#allocation39_spill] sm:$0xff] %v2301_v21 }
 0x121   : > { %2845 = vst [vmem:[#allocation38_spill] sm:$0xff] %v2298_v33  ;;  %v731_v57 = vadd.f32 %v2301_v21, %v2298_v33 }
 0x125   : > { %784 = vmax.xlane.f32.xlu1 %v783_v11  ;;  %v2306_v11 = vsel %vm428_vm14, %v2291_v34, -1e+30 }
 0x126   : > { %790 = vmax.xlane.f32.xlu0 %v789_v58  ;;  %v786_v14 = vmax.f32 %v2306_v11, %v2311_v7 }
 0x127   : > { %778 = vmax.xlane.f32.xlu2 %v777_v40 }
 0x12e   : > { %732 = vadd.xlane.f32.xlu0 %v731_v57 }
 0x12f   : > { %787 = vmax.xlane.f32.xlu2 %v786_v14 }
 0x137   : > { %729 = vadd.xlane.f32.xlu2 %v728_v55 }
 0x150   : > { %v2329_v12 = vpop.xlane.xlu1 %455 }
 0x151   : > { %2851 = vst [vmem:[#allocation44_spill] sm:$0xff] %v2329_v12 }
 0x15f   : > { %v2325_v40 = vpop.xlane.xlu0 %452 }
 0x160   : > { %2849 = vst [vmem:[#allocation42_spill] sm:$0xff] %v2325_v40 }
 0x161   : > { %v2327_v58 = vpop.xlane.xlu2 %449 }
 0x162   : > { %2850 = vst [vmem:[#allocation43_spill] sm:$0xff] %v2327_v58 }
 0x169   : > { %v2331_v5 = vpop.xlane.xlu0 %464 }
 0x16a   : > { %2852 = vst [vmem:[#allocation45_spill] sm:$0xff] %v2331_v5  ;;  %v2333_v14 = vpop.xlane.xlu2 %458 }
 0x16b   : > { %2853 = vst [vmem:[#allocation46_spill] sm:$0xff] %v2333_v14 }
 0x170   : > { %v2335_v57 = vpop.xlane.xlu1 %467 }
 0x171   : > { %2854 = vst [vmem:[#allocation47_spill] sm:$0xff] %v2335_v57  ;;  %v490_v43 = vpop.xlane.xlu0 %489 }
 0x172   : > { %v2337_v53 = vpop.xlane.xlu2 %461  ;;  %v512_v21 = vsub.f32 %v2030_v50, %v490_v43  ;;  %v513_v22 = vsub.f32 %v2035_v44, %v490_v43 }
 0x173   : > { %2855 = vst [vmem:[#allocation48_spill] sm:$0xff] %v2337_v53 }
 0x174   : > { %v528_v55 = vmul.f32 1.442695, %v512_v21  ;;  %v530_v38 = vmul.f32 1.442695, %v513_v22 }
 0x176   : > { %1239 = vpow2.f32 %v528_v55 }
 0x177   : > { %1241 = vpow2.f32 %v530_v38 }
 0x178   : > { %v493_v33 = vpop.xlane.xlu1 %492 }
 0x179   : > { %v514_v12 = vsub.f32 %v2058_v49, %v493_v33  ;;  %v515_v5 = vsub.f32 %v2063_v19, %v493_v33  ;;  %v499_v57 = vpop.xlane.xlu0 %498 }
 0x17a   : > { %v2343_v58 = vpop.xlane.xlu2 %470  ;;  %v518_v53 = vsub.f32 %v2080_v60, %v499_v57  ;;  %v519_v50 = vsub.f32 %v2085_v37, %v499_v57  ;;  %v2859_v60 = vld [vmem:[#allocation27_spill] sm:$0xff] }
 0x17b   : > { %v532_v40 = vmul.f32 1.442695, %v514_v12  ;;  %v534_v14 = vmul.f32 1.442695, %v515_v5  ;;  %2856 = vst [vmem:[#allocation49_spill] sm:$0xff] %v2343_v58 }
 0x17c   : > { %v1240_v44 = vpop.eup %1239  ;;  %v540_v21 = vmul.f32 1.442695, %v518_v53  ;;  %v542_v22 = vmul.f32 1.442695, %v519_v50  ;;  %v2860_v50 = vld [vmem:[#allocation28_spill] sm:$0xff] }
 0x17d   : > { %1243 = vpow2.f32 %v532_v40  ;;  %v1242_v43 = vpop.eup %1241  ;;  %v2348_v38 = vmul.f32 %v1240_v44, %v1828_v23 }
 0x17e   : > { %1245 = vpow2.f32 %v534_v14  ;;  %v2351_v19 = vmul.f32 %v1242_v43, %v1833_v24  ;;  %v2862_v43 = vld [vmem:[#allocation30_spill] sm:$0xff] }
 0x17f   : > { %2857 = vst [vmem:[#allocation50_spill] sm:$0xff] %v2348_v38  ;;  %1247 = vpow2.f32 %v540_v21  ;;  %v2861_v21 = vld [vmem:[#allocation29_spill] sm:$0xff] }
 0x180   : > { %v502_v49 = vpop.xlane.xlu1 %501  ;;  %2858 = vst [vmem:[#allocation51_spill] sm:$0xff] %v2351_v19  ;;  %1249 = vpow2.f32 %v542_v22  ;;  %v576_v37 = vadd.f32 %v2351_v19, %v2348_v38 }
 0x181   : > { %v520_v5 = vsub.f32 %v2098_v56, %v502_v49  ;;  %v521_v12 = vsub.f32 %v2859_v60, %v502_v49  ;;  %v508_v53 = vpop.xlane.xlu0 %507 }
 0x182   : > { %v496_v57 = vpop.xlane.xlu2 %495  ;;  %577 = vadd.xlane.f32.xlu1 %v576_v37  ;;  %v524_v22 = vsub.f32 %v2862_v43, %v508_v53  ;;  %v525_v56 = vsub.f32 %v2863_v41, %v508_v53 }
 0x183   : > { %v1244_v33 = vpop.eup %1243  ;;  %v544_v40 = vmul.f32 1.442695, %v520_v5  ;;  %v546_v14 = vmul.f32 1.442695, %v521_v12  ;;  %v516_v44 = vsub.f32 %v2860_v50, %v496_v57  ;;  %v517_v58 = vsub.f32 %v2861_v21, %v496_v57 }
 0x184   : > { %v1246_v55 = vpop.eup %1245  ;;  %v2362_v49 = vmul.f32 %v1244_v33, %v1788_v46  ;;  %v552_v38 = vmul.f32 1.442695, %v524_v22  ;;  %v554_v42 = vmul.f32 1.442695, %v525_v56 }
 0x185   : > { %1251 = vpow2.f32 %v544_v40  ;;  %v2365_v60 = vmul.f32 %v1246_v55, %v1791_v47  ;;  %v1248_v5 = vpop.eup %1247  ;;  %v536_v12 = vmul.f32 1.442695, %v516_v44  ;;  %v538_v19 = vmul.f32 1.442695, %v517_v58  ;;  %v2864_v40 = vld [vmem:[#allocation32_spill] sm:$0xff] }
 0x186   : > { %1253 = vpow2.f32 %v546_v14  ;;  %v1250_v50 = vpop.eup %1249  ;;  %v2370_v57 = vmul.f32 %v1248_v5, %v1910_v28  ;;  %v2865_v14 = vld [vmem:[#allocation33_spill] sm:$0xff] }
 0x187   : > { %v579_v37 = vadd.f32 %v2365_v60, %v2362_v49  ;;  %1255 = vpow2.f32 %v536_v12  ;;  %v2373_v33 = vmul.f32 %v1250_v50, %v1913_v35 }
 0x188   : > { %v511_v41 = vpop.xlane.xlu1 %510  ;;  %1257 = vpow2.f32 %v538_v19 }
 0x189   : > { %v526_v53 = vsub.f32 %v2864_v40, %v511_v41  ;;  %v527_v55 = vsub.f32 %v2865_v14, %v511_v41  ;;  %580 = vadd.xlane.f32.xlu2 %v579_v37  ;;  %1259 = vpow2.f32 %v552_v38  ;;  %v585_v58 = vadd.f32 %v2373_v33, %v2370_v57  ;;  %v773_v56 = vpop.xlane.xlu0 %772 }
 0x18a   : > { %1261 = vpow2.f32 %v554_v42  ;;  %v505_v22 = vpop.xlane.xlu2 %504  ;;  %v794_v50 = vsub.f32 %v2165_v36, %v773_v56  ;;  %v795_v37 = vsub.f32 %v2169_v59, %v773_v56 }
 0x18b   : > { %v1252_v44 = vpop.eup %1251  ;;  %v556_v21 = vmul.f32 1.442695, %v526_v53  ;;  %v558_v43 = vmul.f32 1.442695, %v527_v55  ;;  %v522_v12 = vsub.f32 %v2154_v4, %v505_v22  ;;  %v523_v19 = vsub.f32 %v2161_v32, %v505_v22  ;;  %586 = vadd.xlane.f32.xlu1 %v585_v58 }
 0x18c   : > { %v1254_v5 = vpop.eup %1253  ;;  %v2384_v38 = vmul.f32 %v1252_v44, %v1960_v29  ;;  %v812_v14 = vmul.f32 1.442695, %v794_v50  ;;  %v814_v55 = vmul.f32 1.442695, %v795_v37 }
 0x18d   : > { %1263 = vpow2.f32 %v556_v21  ;;  %v2387_v42 = vmul.f32 %v1254_v5, %v1963_v17  ;;  %v1256_v41 = vpop.eup %1255  ;;  %v548_v40 = vmul.f32 1.442695, %v522_v12  ;;  %v550_v53 = vmul.f32 1.442695, %v523_v19 }
 0x18e   : > { %1265 = vpow2.f32 %v558_v43  ;;  %v1258_v4 = vpop.eup %1257  ;;  %v2392_v36 = vmul.f32 %v1256_v41, %v1752_v61 }
 0x18f   : > { %v588_v32 = vadd.f32 %v2387_v42, %v2384_v38  ;;  %v1260_v59 = vpop.eup %1259  ;;  %1267 = vpow2.f32 %v548_v40  ;;  %v2395_v44 = vmul.f32 %v1258_v4, %v1755_v62 }
 0x190   : > { %v776_v58 = vpop.xlane.xlu1 %775  ;;  %v1262_v21 = vpop.eup %1261  ;;  %1269 = vpow2.f32 %v550_v53  ;;  %v2400_v56 = vmul.f32 %v1260_v59, %v1982_v16 }
 0x191   : > { %v796_v43 = vsub.f32 %v2198_v63, %v776_v58  ;;  %v797_v22 = vsub.f32 %v2203_v1, %v776_v58  ;;  %589 = vadd.xlane.f32.xlu2 %v588_v32  ;;  %1271 = vpow2.f32 %v812_v14  ;;  %v582_v5 = vadd.f32 %v2395_v44, %v2392_v36  ;;  %v782_v40 = vpop.xlane.xlu0 %781 }
 0x192   : > { %v2405_v12 = vmul.f32 %v1262_v21, %v1987_v20  ;;  %1273 = vpow2.f32 %v814_v55  ;;  %v770_v41 = vpop.xlane.xlu2 %769  ;;  %v800_v4 = vsub.f32 %v2218_v18, %v782_v40  ;;  %v801_v32 = vsub.f32 %v2223_v51, %v782_v40 }
 0x193   : > { %v1264_v19 = vpop.eup %1263  ;;  %v816_v50 = vmul.f32 1.442695, %v796_v43  ;;  %v818_v37 = vmul.f32 1.442695, %v797_v22  ;;  %v792_v1 = vsub.f32 %v2207_v2, %v770_v41  ;;  %v793_v53 = vsub.f32 %v2213_v13, %v770_v41  ;;  %583 = vadd.xlane.f32.xlu0 %v582_v5 }
 0x194   : > { %v1266_v63 = vpop.eup %1265  ;;  %v594_v14 = vadd.f32 %v2405_v12, %v2400_v56  ;;  %v2414_v55 = vmul.f32 %v1264_v19, %v2050_v54  ;;  %v824_v13 = vmul.f32 1.442695, %v800_v4  ;;  %v826_v22 = vmul.f32 1.442695, %v801_v32 }
 0x195   : > { %1275 = vpow2.f32 %v816_v50  ;;  %v2417_v59 = vmul.f32 %v1266_v63, %v2053_v52  ;;  %v1268_v58 = vpop.eup %1267  ;;  %v808_v2 = vmul.f32 1.442695, %v792_v1  ;;  %v810_v21 = vmul.f32 1.442695, %v793_v53 }
 0x196   : > { %1277 = vpow2.f32 %v818_v37  ;;  %595 = vadd.xlane.f32.xlu1 %v594_v14  ;;  %v1270_v43 = vpop.eup %1269  ;;  %v2422_v5 = vmul.f32 %v1268_v58, %v1846_v45 }
 0x197   : > { %v597_v18 = vadd.f32 %v2417_v59, %v2414_v55  ;;  %v1272_v51 = vpop.eup %1271  ;;  %1279 = vpow2.f32 %v808_v2  ;;  %v2425_v50 = vmul.f32 %v1270_v43, %v1851_v27 }
 0x198   : > { %v785_v19 = vpop.xlane.xlu1 %784  ;;  %v1274_v41 = vpop.eup %1273  ;;  %1281 = vpow2.f32 %v810_v21  ;;  %v2430_v63 = vmul.f32 %v1272_v51, %v1788_v46 }
 0x199   : > { %v802_v37 = vsub.f32 %v2256_v25, %v785_v19  ;;  %v803_v40 = vsub.f32 %v2261_v3, %v785_v19  ;;  %598 = vadd.xlane.f32.xlu2 %v597_v18  ;;  %1283 = vpow2.f32 %v824_v13  ;;  %v591_v1 = vadd.f32 %v2425_v50, %v2422_v5  ;;  %v791_v2 = vpop.xlane.xlu0 %790 }
 0x19a   : > { %v2435_v53 = vmul.f32 %v1274_v41, %v1791_v47  ;;  %1285 = vpow2.f32 %v826_v22  ;;  %v779_v58 = vpop.xlane.xlu2 %778  ;;  %v806_v13 = vsub.f32 %v2278_v26, %v791_v2  ;;  %v807_v47 = vsub.f32 %v2283_v39, %v791_v2 }
 0x19b   : > { %v1276_v14 = vpop.eup %1275  ;;  %v828_v4 = vmul.f32 1.442695, %v802_v37  ;;  %v830_v32 = vmul.f32 1.442695, %v803_v40  ;;  %v798_v3 = vsub.f32 %v2266_v6, %v779_v58  ;;  %v799_v21 = vsub.f32 %v2273_v15, %v779_v58  ;;  %592 = vadd.xlane.f32.xlu0 %v591_v1 }
 0x19c   : > { %v1278_v25 = vpop.eup %1277  ;;  %v859_v46 = vadd.f32 %v2435_v53, %v2430_v63  ;;  %v2444_v43 = vmul.f32 %v1276_v14, %v1752_v61  ;;  %v836_v15 = vmul.f32 1.442695, %v806_v13  ;;  %v838_v41 = vmul.f32 1.442695, %v807_v47 }
 0x19d   : > { %1287 = vpow2.f32 %v828_v4  ;;  %v2447_v22 = vmul.f32 %v1278_v25, %v1755_v62  ;;  %v1280_v18 = vpop.eup %1279  ;;  %v820_v6 = vmul.f32 1.442695, %v798_v3  ;;  %v822_v51 = vmul.f32 1.442695, %v799_v21 }
 0x19e   : > { %1289 = vpow2.f32 %v830_v32  ;;  %860 = vadd.xlane.f32.xlu1 %v859_v46  ;;  %v1282_v19 = vpop.eup %1281  ;;  %v2452_v37 = vmul.f32 %v1280_v18, %v1828_v23 }
 0x19f   : > { %v862_v26 = vadd.f32 %v2447_v22, %v2444_v43  ;;  %v1284_v39 = vpop.eup %1283  ;;  %1291 = vpow2.f32 %v820_v6  ;;  %v2455_v40 = vmul.f32 %v1282_v19, %v1833_v24 }
 0x1a0   : > { %v1286_v1 = vpop.eup %1285  ;;  %1293 = vpow2.f32 %v822_v51  ;;  %v2458_v14 = vmul.f32 %v1284_v39, %v1960_v29 }
 0x1a1   : > { %863 = vadd.xlane.f32.xlu2 %v862_v26  ;;  %1295 = vpow2.f32 %v836_v15  ;;  %v856_v4 = vadd.f32 %v2455_v40, %v2452_v37  ;;  %v2463_v32 = vmul.f32 %v1286_v1, %v1963_v17  ;;  %v2493_v1 = vmul.f32 %v1910_v28, %v2239_v31 }
 0x1a2   : > { %1297 = vpow2.f32 %v838_v41  ;;  %v788_v58 = vpop.xlane.xlu2 %787  ;;  %v2515_v31 = vmul.f32 %v1755_v62, %v2177_v48  ;;  %v2531_v62 = vmul.f32 %v1960_v29, %v2189_v0  ;;  %v2535_v48 = vmul.f32 %v1963_v17, %v2193_v9  ;;  %v2870_v0 = vld [vmem:[#allocation36_spill] sm:$0xff] }
 0x1a3   : > { %v1288_v23 = vpop.eup %1287  ;;  %v804_v24 = vsub.f32 %v2306_v11, %v788_v58  ;;  %v805_v25 = vsub.f32 %v2311_v7, %v788_v58  ;;  %857 = vadd.xlane.f32.xlu0 %v856_v4  ;;  %v868_v3 = vadd.f32 %v2463_v32, %v2458_v14  ;;  %v2497_v4 = vmul.f32 %v1913_v35, %v2243_v10 }
 0x1a4   : > { %v1290_v2 = vpop.eup %1289  ;;  %v2470_v21 = vmul.f32 %v1288_v23, %v1846_v45  ;;  %v740_v29 = vadd.f32 %v2535_v48, %v2531_v62  ;;  %v2553_v9 = vmul.f32 %v2050_v54, %v2870_v0 }
 0x1a5   : > { %v2473_v46 = vmul.f32 %v1290_v2, %v1851_v27  ;;  %v1292_v13 = vpop.eup %1291  ;;  %v832_v47 = vmul.f32 1.442695, %v804_v24  ;;  %v834_v18 = vmul.f32 1.442695, %v805_v25  ;;  %v737_v24 = vadd.f32 %v2497_v4, %v2493_v1 }
 0x1a6   : > { %869 = vadd.xlane.f32.xlu1 %v868_v3  ;;  %v1294_v6 = vpop.eup %1293  ;;  %v2478_v7 = vmul.f32 %v1292_v13, %v1910_v28  ;;  %v2521_v3 = vmul.f32 %v1982_v16, %v2291_v34  ;;  %v2525_v13 = vmul.f32 %v1987_v20, %v2295_v8  ;;  %v2869_v34 = vld [vmem:[#allocation35_spill] sm:$0xff]  ;;  %2871 = vst [vmem:[#allocation29_spill] sm:$0xff] %v2553_v9 }
 0x1a7   : > { %v871_v11 = vadd.f32 %v2473_v46, %v2470_v21  ;;  %v1296_v51 = vpop.eup %1295  ;;  %1299 = vpow2.f32 %v832_v47  ;;  %v2481_v15 = vmul.f32 %v1294_v6, %v1913_v35  ;;  %v2511_v35 = vmul.f32 %v1752_v61, %v2173_v30  ;;  %v2868_v30 = vld [vmem:[#allocation34_spill] sm:$0xff]  ;;  %v2872_v47 = vld [vmem:[#allocation37_spill] sm:$0xff] }
 0x1a8   : > { %v1298_v19 = vpop.eup %1297  ;;  %1301 = vpow2.f32 %v834_v18  ;;  %v2484_v41 = vmul.f32 %v1296_v51, %v2050_v54  ;;  %2866 = vst [vmem:[#allocation27_spill] sm:$0xff] %v2521_v3  ;;  %v2545_v8 = vmul.f32 %v1851_v27, %v2869_v34  ;;  %v2874_v34 = vld [vmem:[#allocation50_spill] sm:$0xff] }
 0x1a9   : > { %872 = vadd.xlane.f32.xlu2 %v871_v11  ;;  %v865_v26 = vadd.f32 %v2481_v15, %v2478_v7  ;;  %v2489_v39 = vmul.f32 %v1298_v19, %v2053_v52  ;;  %2867 = vst [vmem:[#allocation28_spill] sm:$0xff] %v2525_v13  ;;  %v734_v61 = vadd.f32 %v2515_v31, %v2511_v35 }
 0x1aa   : > { %v2561_v18 = vpop.xlane.xlu2 %729 }
 0x1ab   : > { %866 = vadd.xlane.f32.xlu0 %v865_v26  ;;  %v877_v23 = vadd.f32 %v2489_v39, %v2484_v41  ;;  %v2563_v26 = vpop.xlane.xlu0 %732 }
 0x1ac   : > { %vm921_vm12 = vcmp.gt.f32.partialorder %v2563_v26, 0.0 }
 0x1ad   : > { %v1300_v58 = vpop.eup %1299 }
 0x1ae   : > { %878 = vadd.xlane.f32.xlu1 %v877_v23  ;;  %v1302_v2 = vpop.eup %1301  ;;  %v2504_v25 = vmul.f32 %v1300_v58, %v1982_v16  ;;  %v746_v16 = vadd.f32 %v2525_v13, %v2521_v3 }
 0x1af   : > { %v2507_v28 = vmul.f32 %v1302_v2, %v1987_v20  ;;  %v2541_v20 = vmul.f32 %v1846_v45, %v2868_v30  ;;  %v2557_v45 = vmul.f32 %v2053_v52, %v2872_v47 }
 0x1b1   : > { %738 = vadd.xlane.f32.xlu2 %v737_v24  ;;  %v874_v10 = vadd.f32 %v2507_v28, %v2504_v25  ;;  %v743_v17 = vadd.f32 %v2545_v8, %v2541_v20  ;;  %2873 = vst [vmem:[#allocation30_spill] sm:$0xff] %v2557_v45  ;;  %v749_v27 = vadd.f32 %v2557_v45, %v2553_v9 }
 0x1b3   : > { %875 = vadd.xlane.f32.xlu0 %v874_v10 }
 0x1b6   : > { %735 = vadd.xlane.f32.xlu1 %v734_v61 }
 0x1b9   : > { %747 = vadd.xlane.f32.xlu2 %v746_v16 }
 0x1bb   : > { %741 = vadd.xlane.f32.xlu0 %v740_v29 }
 0x1be   : > { %744 = vadd.xlane.f32.xlu1 %v743_v17  ;;  %v2875_v17 = vld [vmem:[#allocation51_spill] sm:$0xff] }
 0x1c3   : > { %750 = vadd.xlane.f32.xlu0 %v749_v27 }
 0x1f5   : > { %v578_v6 = vpop.xlane.xlu1 %577 }
 0x1f6   : > { %v600_v11 = vmax.f32 %v578_v6, 1e-30  ;;  %v2876_v6 = vld [vmem:[#allocation43_spill] sm:$0xff] }
 0x1f7   : > { %vm640_vm0 = vcmp.gt.f32.partialorder %v2876_v6, 0.0  ;;  %v2882_v6 = vld [vmem:[#allocation46_spill] sm:$0xff] }
 0x1f8   : > { %1303 = vrcp.f32 %v600_v11  ;;  %vm643_vm6 = vcmp.gt.f32.partialorder %v2882_v6, 0.0 }
 0x1fc   : > { %v581_v51 = vpop.xlane.xlu2 %580 }
 0x1fd   : > { %v601_v19 = vmax.f32 %v581_v51, 1e-30 }
 0x1fe   : > { %v587_v54 = vpop.xlane.xlu1 %586  ;;  %v1304_v23 = vpop.eup %1303 }
 0x1ff   : > { %1305 = vrcp.f32 %v601_v19  ;;  %v603_v58 = vmax.f32 %v587_v54, 1e-30  ;;  %v616_v2 = vmul.f32 %v1304_v23, %v600_v11  ;;  %v2877_v11 = vld [vmem:[#allocation15_spill] sm:$0xff] }
 0x201   : > { %1307 = vrcp.f32 %v603_v58  ;;  %v624_v52 = vsub.f32 2.0, %v616_v2  ;;  %v2878_v2 = vld [vmem:[#allocation16_spill] sm:$0xff] }
 0x203   : > { %v632_v61 = vmul.f32 %v1304_v23, %v624_v52 }
 0x204   : > { %v590_v24 = vpop.xlane.xlu2 %589 }
 0x205   : > { %v1306_v10 = vpop.eup %1305  ;;  %v604_v16 = vmax.f32 %v590_v24, 1e-30  ;;  %v648_v29 = vmul.f32 %v632_v61, %v2874_v34  ;;  %v649_v0 = vmul.f32 %v632_v61, %v2875_v17  ;;  %v2879_v34 = vld [vmem:[#allocation42_spill] sm:$0xff] }
 0x206   : > { %v617_v30 = vmul.f32 %v1306_v10, %v601_v19  ;;  %v584_v47 = vpop.xlane.xlu0 %583  ;;  %vm641_vm1 = vcmp.gt.f32.partialorder %v2879_v34, 0.0 }
 0x207   : > { %1309 = vrcp.f32 %v604_v16  ;;  %v1308_v27 = vpop.eup %1307  ;;  %v602_v54 = vmax.f32 %v584_v47, 1e-30  ;;  %v680_v45 = vsel %vm640_vm0, %v648_v29, %v2877_v11  ;;  %v681_v9 = vsel %vm640_vm0, %v649_v0, %v2878_v2  ;;  %v2880_v0 = vld [vmem:[#allocation13_spill] sm:$0xff]  ;;  %v2883_v11 = vld [vmem:[#allocation19_spill] sm:$0xff] }
 0x208   : > { %v625_v51 = vsub.f32 2.0, %v617_v30  ;;  %v619_v13 = vmul.f32 %v1308_v27, %v603_v58  ;;  %696 = vst [vmem:[%s2571_s30] sm:$0xff] %v680_v45 }
 0x209   : > { %v596_v3 = vpop.xlane.xlu1 %595  ;;  %1311 = vrcp.f32 %v602_v54  ;;  %697 = vst [vmem:[%s2571_s30 + $0x8] sm:$0xff] %v681_v9 }
 0x20a   : > { %v633_v19 = vmul.f32 %v1306_v10, %v625_v51  ;;  %v606_v23 = vmax.f32 %v596_v3, 1e-30  ;;  %v627_v52 = vsub.f32 2.0, %v619_v13  ;;  %v2881_v10 = vld [vmem:[#allocation14_spill] sm:$0xff] }
 0x20c   : > { %v650_v24 = vmul.f32 %v633_v19, %v2362_v49  ;;  %v651_v61 = vmul.f32 %v633_v19, %v2365_v60  ;;  %1313 = vrcp.f32 %v606_v23  ;;  %v599_v30 = vpop.xlane.xlu2 %598  ;;  %v635_v29 = vmul.f32 %v1308_v27, %v627_v52  ;;  %v2884_v19 = vld [vmem:[#allocation20_spill] sm:$0xff] }
 0x20d   : > { %v1310_v58 = vpop.eup %1309  ;;  %v607_v17 = vmax.f32 %v599_v30, 1e-30 }
 0x20e   : > { %v682_v45 = vsel %vm641_vm1, %v650_v24, %v2880_v0  ;;  %v683_v47 = vsel %vm641_vm1, %v651_v61, %v2881_v10  ;;  %v620_v3 = vmul.f32 %v1310_v58, %v604_v16  ;;  %v654_v13 = vmul.f32 %v635_v29, %v2370_v57  ;;  %v593_v60 = vpop.xlane.xlu0 %592 }
 0x20f   : > { %698 = vst [vmem:[%s2571_s30 + $0x10] sm:$0xff] %v682_v45  ;;  %v655_v49 = vmul.f32 %v635_v29, %v2373_v33  ;;  %1315 = vrcp.f32 %v607_v17  ;;  %v1312_v9 = vpop.eup %1311  ;;  %v605_v51 = vmax.f32 %v593_v60, 1e-30  ;;  %v2887_v60 = vld [vmem:[#allocation24_spill] sm:$0xff] }
 0x210   : > { %699 = vst [vmem:[%s2571_s30 + $0x18] sm:$0xff] %v683_v47  ;;  %v628_v27 = vsub.f32 2.0, %v620_v3  ;;  %v686_v2 = vsel %vm643_vm6, %v654_v13, %v2883_v11  ;;  %v618_v16 = vmul.f32 %v1312_v9, %v602_v54  ;;  %v2885_v47 = vld [vmem:[#allocation48_spill] sm:$0xff] }
 0x211   : > { %v687_v52 = vsel %vm643_vm6, %v655_v49, %v2884_v19  ;;  %v861_v24 = vpop.xlane.xlu1 %860  ;;  %702 = vst [vmem:[%s2571_s30 + $0x30] sm:$0xff] %v686_v2  ;;  %1317 = vrcp.f32 %v605_v51  ;;  %vm644_vm7 = vcmp.gt.f32.partialorder %v2885_v47, 0.0  ;;  %v2888_v19 = vld [vmem:[#allocation44_spill] sm:$0xff]  ;;  %v2892_v47 = vld [vmem:[#allocation21_spill] sm:$0xff] }
 0x212   : > { %v1314_v61 = vpop.eup %1313  ;;  %v636_v57 = vmul.f32 %v1310_v58, %v628_v27  ;;  %v881_v30 = vmax.f32 %v861_v24, 1e-30  ;;  %703 = vst [vmem:[%s2571_s30 + $0x38] sm:$0xff] %v687_v52  ;;  %v626_v34 = vsub.f32 2.0, %v618_v16  ;;  %v2886_v58 = vld [vmem:[#allocation23_spill] sm:$0xff]  ;;  %vm642_vm8 = vcmp.gt.f32.partialorder %v2888_v19, 0.0 }
 0x213   : > { %v622_v33 = vmul.f32 %v1314_v61, %v606_v23  ;;  %v2889_v52 = vld [vmem:[#allocation47_spill] sm:$0xff]  ;;  %v2897_v19 = vld [vmem:[#allocation45_spill] sm:$0xff] }
 0x214   : > { %v656_v29 = vmul.f32 %v636_v57, %v2384_v38  ;;  %v657_v0 = vmul.f32 %v636_v57, %v2387_v42  ;;  %1319 = vrcp.f32 %v881_v30  ;;  %v864_v45 = vpop.xlane.xlu2 %863  ;;  %v634_v3 = vmul.f32 %v1312_v9, %v626_v34  ;;  %v2890_v24 = vld [vmem:[#allocation11_spill] sm:$0xff] }
 0x215   : > { %v1316_v10 = vpop.eup %1315  ;;  %v630_v54 = vsub.f32 2.0, %v622_v33  ;;  %v882_v13 = vmax.f32 %v864_v45, 1e-30  ;;  %vm646_vm9 = vcmp.gt.f32.partialorder %v2889_v52, 0.0  ;;  %vm645_vm11 = vcmp.gt.f32.partialorder %v2897_v19, 0.0 }
 0x216   : > { %v688_v49 = vsel %vm644_vm7, %v656_v29, %v2886_v58  ;;  %v689_v6 = vsel %vm644_vm7, %v657_v0, %v2887_v60  ;;  %v623_v27 = vmul.f32 %v1316_v10, %v607_v17  ;;  %v652_v38 = vmul.f32 %v634_v3, %v2392_v36  ;;  %v858_v11 = vpop.xlane.xlu0 %857 }
 0x217   : > { %704 = vst [vmem:[%s2571_s30 + $0x40] sm:$0xff] %v688_v49  ;;  %v638_v23 = vmul.f32 %v1314_v61, %v630_v54  ;;  %v653_v42 = vmul.f32 %v634_v3, %v2395_v44  ;;  %1321 = vrcp.f32 %v882_v13  ;;  %v1318_v2 = vpop.eup %1317  ;;  %v880_v16 = vmax.f32 %v858_v11, 1e-30  ;;  %v2891_v44 = vld [vmem:[#allocation12_spill] sm:$0xff]  ;;  %v2893_v54 = vld [vmem:[#allocation22_spill] sm:$0xff] }
 0x218   : > { %705 = vst [vmem:[%s2571_s30 + $0x48] sm:$0xff] %v689_v6  ;;  %v631_v9 = vsub.f32 2.0, %v623_v27  ;;  %v684_v61 = vsel %vm642_vm8, %v652_v38, %v2890_v24  ;;  %v621_v0 = vmul.f32 %v1318_v2, %v605_v51  ;;  %v2894_v6 = vld [vmem:[#allocation49_spill] sm:$0xff] }
 0x219   : > { %v660_v17 = vmul.f32 %v638_v23, %v2400_v56  ;;  %v661_v36 = vmul.f32 %v638_v23, %v2405_v12  ;;  %v685_v57 = vsel %vm642_vm8, %v653_v42, %v2891_v44  ;;  %v870_v33 = vpop.xlane.xlu1 %869  ;;  %700 = vst [vmem:[%s2571_s30 + $0x20] sm:$0xff] %v684_v61  ;;  %1323 = vrcp.f32 %v880_v16 }
 0x21a   : > { %v1320_v34 = vpop.eup %1319  ;;  %v639_v29 = vmul.f32 %v1316_v10, %v631_v9  ;;  %v884_v45 = vmax.f32 %v870_v33, 1e-30  ;;  %701 = vst [vmem:[%s2571_s30 + $0x28] sm:$0xff] %v685_v57  ;;  %v629_v10 = vsub.f32 2.0, %v621_v0  ;;  %vm647_vm10 = vcmp.gt.f32.partialorder %v2894_v6, 0.0  ;;  %v2899_v0 = vld [vmem:[#allocation18_spill] sm:$0xff] }
 0x21b   : > { %v692_v56 = vsel %vm646_vm9, %v660_v17, %v2892_v47  ;;  %v693_v12 = vsel %vm646_vm9, %v661_v36, %v2893_v54  ;;  %v897_v3 = vmul.f32 %v1320_v34, %v881_v30 }
 0x21c   : > { %708 = vst [vmem:[%s2571_s30 + $0x60] sm:$0xff] %v692_v56  ;;  %v662_v58 = vmul.f32 %v639_v29, %v2414_v55  ;;  %v663_v51 = vmul.f32 %v639_v29, %v2417_v59  ;;  %1325 = vrcp.f32 %v884_v45  ;;  %v873_v49 = vpop.xlane.xlu2 %872  ;;  %v2895_v55 = vld [vmem:[#allocation25_spill] sm:$0xff]  ;;  %v2896_v59 = vld [vmem:[#allocation26_spill] sm:$0xff]  ;;  %v637_v42 = vmul.f32 %v1318_v2, %v629_v10 }
 0x21d   : > { %v1322_v60 = vpop.eup %1321  ;;  %709 = vst [vmem:[%s2571_s30 + $0x68] sm:$0xff] %v693_v12  ;;  %v905_v27 = vsub.f32 2.0, %v897_v3  ;;  %v885_v23 = vmax.f32 %v873_v49, 1e-30  ;;  %v2898_v29 = vld [vmem:[#allocation17_spill] sm:$0xff] }
 0x21e   : > { %v694_v30 = vsel %vm647_vm10, %v662_v58, %v2895_v55  ;;  %v695_v38 = vsel %vm647_vm10, %v663_v51, %v2896_v59  ;;  %v898_v11 = vmul.f32 %v1322_v60, %v882_v13  ;;  %v2629_v9 = vpop.xlane.xlu0 %866  ;;  %v658_v36 = vmul.f32 %v637_v42, %v2422_v5 }
 0x21f   : > { %710 = vst [vmem:[%s2571_s30 + $0x70] sm:$0xff] %v694_v30  ;;  %v913_v52 = vmul.f32 %v1320_v34, %v905_v27  ;;  %1327 = vrcp.f32 %v885_v23  ;;  %v1324_v17 = vpop.eup %1323  ;;  %v659_v24 = vmul.f32 %v637_v42, %v2425_v50  ;;  %v883_v33 = vmax.f32 %v2629_v9, 1e-30 }
 0x220   : > { %711 = vst [vmem:[%s2571_s30 + $0x78] sm:$0xff] %v695_v38  ;;  %v906_v61 = vsub.f32 2.0, %v898_v11  ;;  %v896_v44 = vmul.f32 %v1324_v17, %v880_v16  ;;  %v690_v5 = vsel %vm645_vm11, %v658_v36, %v2898_v29  ;;  %v2901_v16 = vld [vmem:[#allocation39_spill] sm:$0xff] }
 0x221   : > { %v930_v13 = vmul.f32 %v913_v52, %v2430_v63  ;;  %v931_v2 = vmul.f32 %v913_v52, %v2435_v53  ;;  %v879_v57 = vpop.xlane.xlu1 %878  ;;  %v691_v50 = vsel %vm645_vm11, %v659_v24, %v2899_v0  ;;  %v2900_v63 = vld [vmem:[#allocation38_spill] sm:$0xff]  ;;  %706 = vst [vmem:[%s2571_s30 + $0x50] sm:$0xff] %v690_v5 }
 0x222   : > { %v1326_v34 = vpop.eup %1325  ;;  %v914_v47 = vmul.f32 %v1322_v60, %v906_v61  ;;  %v887_v56 = vmax.f32 %v879_v57, 1e-30  ;;  %v904_v3 = vsub.f32 2.0, %v896_v44  ;;  %707 = vst [vmem:[%s2571_s30 + $0x58] sm:$0xff] %v691_v50 }
 0x223   : > { %v962_v53 = vsel %vm921_vm12, %v930_v13, %v2900_v63  ;;  %v963_v54 = vsel %vm921_vm12, %v931_v2, %v2901_v16  ;;  %v900_v12 = vmul.f32 %v1326_v34, %v884_v45 }
 0x224   : > { %978 = vst [vmem:[%s2658_s14 + $0x10] sm:$0xff] %v962_v53  ;;  %1329 = vrcp.f32 %v887_v56  ;;  %v912_v26 = vmul.f32 %v1324_v17, %v904_v3  ;;  %v932_v10 = vmul.f32 %v914_v47, %v2444_v43  ;;  %v933_v49 = vmul.f32 %v914_v47, %v2447_v22 }
 0x225   : > { %v1328_v58 = vpop.eup %1327  ;;  %979 = vst [vmem:[%s2658_s14 + $0x18] sm:$0xff] %v963_v54  ;;  %1331 = vrcp.f32 %v883_v33  ;;  %v908_v45 = vsub.f32 2.0, %v900_v12 }
 0x226   : > { %v901_v51 = vmul.f32 %v1328_v58, %v885_v23  ;;  %v928_v60 = vmul.f32 %v912_v26, %v2452_v37  ;;  %v929_v6 = vmul.f32 %v912_v26, %v2455_v40  ;;  %v876_v27 = vpop.xlane.xlu0 %875 }
 0x227   : > { %1392 = shalt.err (!%p1389_p4)
}
 0x228   : > { %s1470_s29 = smov 256   ;;  %s1471_s20 = smov 16   ;;  %vm920_vm13 = vcmp.gt.f32.partialorder %v2561_v18, 0.0  ;;  %v909_v43 = vsub.f32 2.0, %v901_v51  ;;  %v886_v22 = vmax.f32 %v876_v27, 1e-30  ;;  %v916_v38 = vmul.f32 %v1326_v34, %v908_v45  ;;  %v739_v52 = vpop.xlane.xlu2 %738 }
 0x229   : > { %1183 = dma.vmem_to_hbm [thread:$0]  (%p1536_p10), %s2653_s7, 2048, %s2655_s8, %s993_s16, %s1470_s29, %s1470_s29, %s1471_s20   ;;  %v2902_v37 = vld [vmem:[#allocation40_spill] sm:$0xff]  ;;  %v2903_v23 = vld [vmem:[#allocation41_spill] sm:$0xff]  ;;  %v736_v30 = vpop.xlane.xlu1 %735  ;;  %vm923_vm5 = vcmp.gt.f32.partialorder %v739_v52, 0.0  ;;  %v2907_v54 = vld [vmem:[#allocation30_spill] sm:$0xff] }
 0x22a   : > { %v960_v40 = vsel %vm920_vm13, %v928_v60, %v2902_v37  ;;  %v961_v55 = vsel %vm920_vm13, %v929_v6, %v2903_v23  ;;  %v1330_v59 = vpop.eup %1329  ;;  %vm922_vm14 = vcmp.gt.f32.partialorder %v736_v30, 0.0  ;;  %1333 = vrcp.f32 %v886_v22  ;;  %s1028_s5 = scalar_lea.hbm %s2766_s2, %s1178_s3  ;;  %s1029_s13 = sshll.u32 %s2658_s14, 4  ;;  %v2905_v53 = vld [vmem:[#allocation28_spill] sm:$0xff]  ;;  %v2906_v16 = vld [vmem:[#allocation29_spill] sm:$0xff]  ;;  %s1030_s13 = int_to_ptr.vmem [resolvable:$true] %s1029_s13 }
 0x22b   : > { %976 = vst [vmem:[%s2658_s14] sm:$0xff] %v960_v40  ;;  %v1332_v42 = vpop.eup %1331  ;;  %v917_v11 = vmul.f32 %v1328_v58, %v909_v43  ;;  %v903_v19 = vmul.f32 %v1330_v59, %v887_v56  ;;  %v964_v18 = vsel %vm922_vm14, %v932_v10, %v2511_v35  ;;  %v965_v17 = vsel %vm922_vm14, %v933_v49, %v2515_v31  ;;  %s1031_s6 = sshll.u32 %s1028_s5, 4  ;;  %v2904_v56 = vld [vmem:[#allocation27_spill] sm:$0xff]  ;;  %s998_s3 = scalar_lea.sflag [#allocation7], %s1572_s25  ;;  %s1032_s6 = int_to_ptr.hbm [resolvable:$true] %s1031_s6 }
 0x22c   : > { %977 = vst [vmem:[%s2658_s14 + $0x8] sm:$0xff] %v961_v55  ;;  %v899_v36 = vmul.f32 %v1332_v42, %v883_v33  ;;  %v936_v61 = vmul.f32 %v916_v38, %v2458_v14  ;;  %v937_v13 = vmul.f32 %v916_v38, %v2463_v32  ;;  %s1407_s7 = sshra.s32 %s1032_s6, 4  ;;  %s1413_s19 = scalar_lea.hbm %s2766_s2, 512  ;;  %s1408_s7 = int_to_ptr.hbm [resolvable:$true] %s1407_s7 }
 0x22d   : > { %980 = vst [vmem:[%s2658_s14 + $0x20] sm:$0xff] %v964_v18  ;;  %v911_v2 = vsub.f32 2.0, %v903_v19  ;;  %v938_v44 = vmul.f32 %v917_v11, %v2470_v21  ;;  %v939_v31 = vmul.f32 %v917_v11, %v2473_v46  ;;  %s1409_s8 = scalar_lea.hbm %s1408_s7, 128  ;;  %p1414_p9 = scmp.lt.s32.totalorder %s1408_s7, %s2766_s2 }
 0x22e   : > { %981 = vst [vmem:[%s2658_s14 + $0x28] sm:$0xff] %v965_v17  ;;  %v907_v24 = vsub.f32 2.0, %v899_v36  ;;  %v742_v57 = vpop.xlane.xlu0 %741  ;;  %p1410_p5 = scmp.ne.s32.totalorder %s1408_s7, %s1409_s8  ;;  %p1415_p1 = scmp.lt.s32.totalorder %s1413_s19, %s1409_s8 }
 0x22f   : > { %vm924_vm15 = vcmp.gt.f32.partialorder %v742_v57, 0.0  ;;  %v919_v5 = vmul.f32 %v1330_v59, %v911_v2 }
 0x230   : > { %v1334_v34 = vpop.eup %1333  ;;  %v915_v35 = vmul.f32 %v1332_v42, %v907_v24  ;;  %v968_v29 = vsel %vm924_vm15, %v936_v61, %v2531_v62  ;;  %v969_v14 = vsel %vm924_vm15, %v937_v13, %v2535_v48  ;;  %v748_v48 = vpop.xlane.xlu2 %747  ;;  %p1411_p7 = pnand %p1410_p5, %p1536_p10  ;;  %p1416_p6 = por %p1415_p1, %p1414_p9 }
 0x231   : > { %v902_v9 = vmul.f32 %v1334_v34, %v886_v22  ;;  %v745_v33 = vpop.xlane.xlu1 %744  ;;  %984 = vst [vmem:[%s2658_s14 + $0x40] sm:$0xff] %v968_v29  ;;  %vm926_vm2 = vcmp.gt.f32.partialorder %v748_v48, 0.0  ;;  %v943_v47 = vmul.f32 %v919_v5, %v2489_v39 }
 0x232   : > { %v934_v32 = vmul.f32 %v915_v35, %v2478_v7  ;;  %v935_v21 = vmul.f32 %v915_v35, %v2481_v15  ;;  %vm925_vm4 = vcmp.gt.f32.partialorder %v745_v33, 0.0  ;;  %985 = vst [vmem:[%s2658_s14 + $0x48] sm:$0xff] %v969_v14  ;;  %p1412_p8 = pneg %p1411_p7 }
 0x233   : > { %v910_v46 = vsub.f32 2.0, %v902_v9  ;;  %v970_v0 = vsel %vm925_vm4, %v938_v44, %v2541_v20  ;;  %v971_v7 = vsel %vm925_vm4, %v939_v31, %v2545_v8 }
 0x234   : > { %v966_v50 = vsel %vm923_vm5, %v934_v32, %v2493_v1  ;;  %v967_v62 = vsel %vm923_vm5, %v935_v21, %v2497_v4  ;;  %986 = vst [vmem:[%s2658_s14 + $0x50] sm:$0xff] %v970_v0  ;;  %v942_v4 = vmul.f32 %v919_v5, %v2484_v41  ;;  %p1417_p12 = pnand %p1416_p6, %p1412_p8 }
 0x235   : > { %982 = vst [vmem:[%s2658_s14 + $0x30] sm:$0xff] %v966_v50  ;;  %v918_v15 = vmul.f32 %v1334_v34, %v910_v46 }
 0x236   : > { %983 = vst [vmem:[%s2658_s14 + $0x38] sm:$0xff] %v967_v62  ;;  %v751_v8 = vpop.xlane.xlu0 %750 }
 0x237   : > { %v940_v20 = vmul.f32 %v918_v15, %v2504_v25  ;;  %v941_v1 = vmul.f32 %v918_v15, %v2507_v28  ;;  %987 = vst [vmem:[%s2658_s14 + $0x58] sm:$0xff] %v971_v7  ;;  %vm927_vm3 = vcmp.gt.f32.partialorder %v751_v8, 0.0 }
 0x238   : > { %v974_v28 = vsel %vm927_vm3, %v942_v4, %v2906_v16  ;;  %v975_v12 = vsel %vm927_vm3, %v943_v47, %v2907_v54 }
 0x239   : > { %v972_v63 = vsel %vm926_vm2, %v940_v20, %v2904_v56  ;;  %v973_v25 = vsel %vm926_vm2, %v941_v1, %v2905_v53  ;;  %990 = vst [vmem:[%s2658_s14 + $0x70] sm:$0xff] %v974_v28 }
 0x23a   : > { %988 = vst [vmem:[%s2658_s14 + $0x60] sm:$0xff] %v972_v63 }
 0x23b   : > { %989 = vst [vmem:[%s2658_s14 + $0x68] sm:$0xff] %v973_v25 }
 0x23c   : > { %991 = vst [vmem:[%s2658_s14 + $0x78] sm:$0xff] %v975_v12 }
 0x23d   : > { %1420 = shalt.err (!%p1417_p12)
}
 0x23e   : > { %1184 = dma.vmem_to_hbm [thread:$0]  (%p1536_p10), %s1030_s13, 2048, %s1032_s6, %s998_s3, %s1470_s29, %s1470_s29, %s1471_s20  }
 0x23f PF: > { %p1199_p13 = scmp.ge.s32.totalorder %s1463_s12, 2  ;;  %s1046_s25 = sand.u32 1, %s1451_s9  }
 0x240   : > { %s1047_s14 = scalar_lea.sflag [#allocation4], %s1046_s25 }
 0x241   : > { %p1192_p0 = pnand %p1199_p13, %p1540_p11 }
 0x243   : > { %p1193_p2 = pneg %p1192_p0 }
 0x245   : > { %1442 = dma.done.wait (%p1193_p2), %s1047_s14, 2048  }
 0x246   : > { %1444 = vsyncadd (%p1193_p2), %s1047_s14, 4294965248  ;;  %s1057_s26 = scalar_lea.sflag [#allocation7], %s1046_s25 }
 0x247   : > { %1446 = dma.done.wait (%p1193_p2), %s1057_s26, 2048  }
 0x248   : > { %1448 = vsyncadd (%p1193_p2), %s1057_s26, 4294965248  ;;  %p19_p10 = scmp.ge.s32.totalorder %s1512_s15, 6   ;;  %s2908_s9 = smov %s1455_s10 }
 0x249   : > { %s2909_s10 = smov %s1459_s11  ;;  %s2910_s11 = smov %s1524_s18 }
 0x24a   : > { %s2911_s12 = smov %s1512_s15  ;;  %21 = sbr.rel (!%p19_p10) target bundleno = 7 (0x7), region = 86 }
 0x24f   :  { %1063 = vsyncpa [#allocation3], 1 }
 0x250   :  { %1065 = vsyncpa [#allocation3 + $0x1], 1 }
 0x251   :  { %1066 = vsyncpa [#allocation4], 1 }
 0x252   :  { %1068 = vsyncpa [#allocation4 + $0x1], 1 }
 0x253   :  { %1069 = vsyncpa [#allocation7], 1 }
 0x254   :  { %1071 = vsyncpa [#allocation7 + $0x1], 1 }

</bundles_post_ra>
